<compile_context>
chip_gen: v6e
topology: v6e:2x2x1
jax: 0.10.0
libtpu: 0.0.40
codegen_flags: <defaults>
</compile_context>

<pallas_src>
import jax
import jax.numpy as jnp
from jax import lax
from jax.experimental import pallas as pl
from jax.experimental.pallas import tpu as pltpu


# ---------------------------------------------------------------------------
# Pallas kernel: one (image, row-tile) step of the RPN head.
#   x_ref     : (1, 1, tile_h+2, W+2, Cin)   haloed input tile (matmul dtype)
#   wconv_ref : (9, Cin, Cmid)               3x3 conv taps (ky-major, kx)
#   bconv_ref : (1, Cmid)                    f32 conv bias
#   whead_ref : (Cmid, KP)                   fused+padded 1x1 head weights
#   bhead_ref : (1, KP)                      f32 fused+padded head bias
#   out_ref   : (1, tile_h*W, KP)            f32 fused head output (lane-dense)
# ---------------------------------------------------------------------------
def _rpn_head_kernel(x_ref, wconv_ref, bconv_ref, whead_ref, bhead_ref, out_ref):
    _, _, thp2, wp, cin = x_ref.shape
    th, w = thp2 - 2, wp - 2
    cmid = wconv_ref.shape[-1]
    mm_dtype = x_ref.dtype

    xt = x_ref[0, 0]  # (tile_h+2, W+2, Cin)

    # 3x3 SAME conv as 9 shifted matmuls accumulating in f32 (no im2col tensor).
    t = jnp.zeros((th * w, cmid), jnp.float32)
    for ky in range(3):
        for kx in range(3):
            patch = xt[ky:ky + th, kx:kx + w, :].reshape(th * w, cin)
            t = t + jnp.dot(patch, wconv_ref[ky * 3 + kx],
                            preferred_element_type=jnp.float32)

    # Bias + ReLU in f32 (safe on v5e where VPU has no bf16 path).
    t = jnp.maximum(t + bconv_ref[...], 0.0)

    # Fused 1x1 heads: one matmul, lane-dense (T, KP) output.
    out = jnp.dot(t.astype(mm_dtype), whead_ref[...],
                  preferred_element_type=jnp.float32)
    out_ref[0] = out + bhead_ref[...]


def rpn_head_pallas(x_nchw, params, *, tile_h=None, matmul_dtype=jnp.float32):
    """Run the RPN head on one feature level.

    Args:
      x_nchw: (N, Cin, H, W) float32 feature map (PyTorch NCHW convention).
      params: dict of weights (torch layouts: conv OIHW, bias (O,)).
      tile_h: rows per grid tile (must divide H). Default picks ~2048 tokens.
      matmul_dtype: jnp.float32 (default) or jnp.bfloat16 for the MXU inputs
        (accumulation / bias / ReLU stay f32).

    Returns:
      (objectness, rpn_box_regression, centerness, rpn_center_box_regression)
      in NCHW: (N, A, H, W), (N, 4A, H, W), (N, A, H, W), (N, 4A, H, W).
    """
    N, Cin, H, W = x_nchw.shape

    wconv_t = params["conv_w"]            # (Cmid, Cin, 3, 3)
    Cmid = wconv_t.shape[0]
    A = params["cls_w"].shape[0]          # anchors per location
    A4 = params["box_w"].shape[0]         # 4 * anchors
    K = A + A4 + A + A4                   # fused head width (10*A)
    KP = ((K + 127) // 128) * 128         # lane-dense padded width

    # --- tile size: largest divisor of H giving ~<=2048 output tokens/tile ---
    if tile_h is None:
        target_rows = max(1, 2048 // max(W, 1))
        tile_h = 1
        for d in range(1, H + 1):
            if H % d == 0 and d <= target_rows:
                tile_h = d
    assert H % tile_h == 0, "tile_h must divide H"
    nT = H // tile_h
    T = tile_h * W

    # --- glue: NCHW -> NHWC, spatial zero pad, haloed row tiles ---------------
    x_nhwc = jnp.transpose(x_nchw, (0, 2, 3, 1)).astype(matmul_dtype)
    x_pad = jnp.pad(x_nhwc, ((0, 0), (1, 1), (1, 1), (0, 0)))
    # (N, nT, tile_h+2, W+2, Cin): each tile carries its 1-row halo.
    x_tiles = jnp.stack(
        [x_pad[:, i * tile_h: i * tile_h + tile_h + 2] for i in range(nT)],
        axis=1,
    )

    # --- glue: weight repacking -----------------------------------------------
    # conv: OIHW -> (ky, kx, Cin, Cmid) -> (9, Cin, Cmid), tap = ky*3 + kx
    wconv = jnp.transpose(wconv_t, (2, 3, 1, 0)).reshape(9, Cin, Cmid)
    wconv = wconv.astype(matmul_dtype)
    bconv = params["conv_b"].reshape(1, Cmid).astype(jnp.float32)

    def head_w(w):  # (O, Cmid, 1, 1) -> (Cmid, O)
        return jnp.transpose(w.reshape(w.shape[0], Cmid), (1, 0))

    whead = jnp.concatenate(
        [head_w(params["cls_w"]), head_w(params["box_w"]),
         head_w(params["ctr_w"]), head_w(params["cbx_w"])], axis=1)      # (Cmid, K)
    bhead = jnp.concatenate(
        [params["cls_b"], params["box_b"], params["ctr_b"], params["cbx_b"]])  # (K,)
    whead = jnp.pad(whead, ((0, 0), (0, KP - K))).astype(matmul_dtype)
    bhead = jnp.pad(bhead, (0, KP - K)).reshape(1, KP).astype(jnp.float32)

    # --- pallas call -----------------------------------------------------------
    out = pl.pallas_call(
        _rpn_head_kernel,
        out_shape=jax.ShapeDtypeStruct((N, H * W, KP), jnp.float32),
        grid_spec=pltpu.PrefetchScalarGridSpec(
            num_scalar_prefetch=0,
            grid=(N, nT),
            in_specs=[
                pl.BlockSpec((1, 1, tile_h + 2, W + 2, Cin),
                             lambda n, h: (n, h, 0, 0, 0)),
                pl.BlockSpec((9, Cin, Cmid), lambda n, h: (0, 0, 0)),
                pl.BlockSpec((1, Cmid), lambda n, h: (0, 0)),
                pl.BlockSpec((Cmid, KP), lambda n, h: (0, 0)),
                pl.BlockSpec((1, KP), lambda n, h: (0, 0)),
            ],
            out_specs=pl.BlockSpec((1, T, KP), lambda n, h: (n, h, 0)),
        ),
        compiler_params=pltpu.CompilerParams(
            dimension_semantics=("parallel", "parallel"),
            vmem_limit_bytes=32 * 1024 * 1024,
        ),
    )(x_tiles, wconv, bconv, whead, bhead)

    # --- glue: slice the fused/padded output back into the four NCHW heads ----
    out = out.reshape(N, H, W, KP)

    def to_nchw(y):  # (N, H, W, K) -> (N, K, H, W)
        return jnp.transpose(y, (0, 3, 1, 2))

    o0, o1, o2 = A, A + A4, A + A4 + A
    obj = to_nchw(out[..., 0:o0])
    box = to_nchw(out[..., o0:o1])
    ctr = to_nchw(out[..., o1:o2])
    cbx = to_nchw(out[..., o2:K])
    return obj, box, ctr, cbx


# ---------------------------------------------------------------------------
# Pure-JAX reference (lax conv, NCHW) for correctness check
# ---------------------------------------------------------------------------
def rpn_head_reference(x, params):
    dn = ("NCHW", "OIHW", "NCHW")

    def conv(inp, w, b, pad):
        y = lax.conv_general_dilated(inp, w, (1, 1), pad, dimension_numbers=dn)
        return y + b.reshape(1, -1, 1, 1)

    t = jax.nn.relu(conv(x, params["conv_w"], params["conv_b"], "SAME"))
    obj = conv(t, params["cls_w"], params["cls_b"], "VALID")
    box = conv(t, params["box_w"], params["box_b"], "VALID")
    ctr = conv(t, params["ctr_w"], params["ctr_b"], "VALID")
    cbx = conv(t, params["cbx_w"], params["cbx_b"], "VALID")
    return obj, box, ctr, cbx


if __name__ == "__main__":
    # Small, deterministic setup consistent with the module:
    #   batch=2, in_channels=4, 16x16 feature map, 3 anchors per location.
    N, Cin, H, W = 2, 4, 16, 16
    A = 3                      # anchors per location
    Cmid = Cin                 # RPN head tower keeps in_channels

    key = jax.random.PRNGKey(0)
    ks = jax.random.split(key, 6)

    x = jax.random.normal(ks[0], (N, Cin, H, W), dtype=jnp.float32)

    # RPNHead init: normal(std=0.01) weights, zero bias (torch layouts).
    params = {
        "conv_w": 0.01 * jax.random.normal(ks[1], (Cmid, Cin, 3, 3), jnp.float32),
        "conv_b": jnp.zeros((Cmid,), jnp.float32),
        "cls_w": 0.01 * jax.random.normal(ks[2], (A, Cmid, 1, 1), jnp.float32),
        "cls_b": jnp.zeros((A,), jnp.float32),
        "box_w": 0.01 * jax.random.normal(ks[3], (4 * A, Cmid, 1, 1), jnp.float32),
        "box_b": jnp.zeros((4 * A,), jnp.float32),
        "ctr_w": 0.01 * jax.random.normal(ks[4], (A, Cmid, 1, 1), jnp.float32),
        "ctr_b": jnp.zeros((A,), jnp.float32),
        "cbx_w": 0.01 * jax.random.normal(ks[5], (4 * A, Cmid, 1, 1), jnp.float32),
        "cbx_b": jnp.zeros((4 * A,), jnp.float32),
    }

    # f32 path (tile_h=8 -> 2 row tiles per image, exercising the tiled grid).
    outs = rpn_head_pallas(x, params, tile_h=8)
    outs = jax.block_until_ready(outs)

    refs = rpn_head_reference(x, params)
    for o, r in zip(outs, refs):
        assert o.shape == r.shape and o.dtype == r.dtype
        assert jnp.allclose(o, r, atol=1e-5, rtol=1e-5), "mismatch vs reference"

    # bf16-matmul path (v6e/v7x fast path): f32 accumulation, loose tolerance.
    outs_bf16 = jax.block_until_ready(
        rpn_head_pallas(x, params, tile_h=8, matmul_dtype=jnp.bfloat16))
    for o, r in zip(outs_bf16, refs):
        assert o.shape == r.shape
        assert jnp.allclose(o, r, atol=1e-2, rtol=1e-1), "bf16 path mismatch"

    print("KERNEL_OK")
</pallas_src>

<mosaic_0001>
module attributes {stable_mosaic.version = 11 : i64} {
  func.func @_rpn_head_kernel(%arg0: i32, %arg1: i32, %arg2: memref<1x1x10x18x4xf32, #tpu.memory_space<vmem>>, %arg3: memref<9x4x4xf32, #tpu.memory_space<vmem>>, %arg4: memref<1x4xf32, #tpu.memory_space<vmem>>, %arg5: memref<4x128xf32, #tpu.memory_space<vmem>>, %arg6: memref<1x128xf32, #tpu.memory_space<vmem>>, %arg7: memref<1x128x128xf32, #tpu.memory_space<vmem>>) attributes {dimension_semantics = [#tpu.dimension_semantics<parallel>, #tpu.dimension_semantics<parallel>], iteration_bounds = array<i64: 2, 2>, scalar_prefetch = 0 : i64, scratch_operands = 0 : i64, tpu.core_type = #tpu.core_type<tc>, window_params = [{transform_indices = @transform_0, window_bounds = array<i64: 1, 1, 10, 18, 4>}, {pipeline_mode = #tpu.pipeline_mode<synchronous>, transform_indices = @transform_1, window_bounds = array<i64: 9, 4, 4>}, {pipeline_mode = #tpu.pipeline_mode<synchronous>, transform_indices = @transform_2, window_bounds = array<i64: 1, 4>}, {pipeline_mode = #tpu.pipeline_mode<synchronous>, transform_indices = @transform_3, window_bounds = array<i64: 4, 128>}, {pipeline_mode = #tpu.pipeline_mode<synchronous>, transform_indices = @transform_4, window_bounds = array<i64: 1, 128>}, {transform_indices = @transform_5, window_bounds = array<i64: 1, 128, 128>}]} {
    %c0 = arith.constant 0 : index
    %c0_0 = arith.constant 0 : index
    %c0_1 = arith.constant 0 : index
    %c0_2 = arith.constant 0 : index
    %c0_3 = arith.constant 0 : index
    %0 = vector.load %arg2[%c0, %c0_0, %c0_1, %c0_2, %c0_3] : memref<1x1x10x18x4xf32, #tpu.memory_space<vmem>>, vector<1x1x10x18x4xf32>
    %1 = vector.shape_cast %0 : vector<1x1x10x18x4xf32> to vector<10x18x4xf32>
    %cst = arith.constant 0.000000e+00 : f32
    %2 = vector.broadcast %cst : f32 to vector<128x4xf32>
    %3 = vector.extract_strided_slice %1 {offsets = [0, 0, 0], sizes = [8, 16, 4], strides = [1, 1, 1]} : vector<10x18x4xf32> to vector<8x16x4xf32>
    %4 = vector.shape_cast %3 : vector<8x16x4xf32> to vector<128x4xf32>
    %c0_4 = arith.constant 0 : index
    %c0_5 = arith.constant 0 : index
    %c0_6 = arith.constant 0 : index
    %5 = vector.load %arg3[%c0_4, %c0_5, %c0_6] : memref<9x4x4xf32, #tpu.memory_space<vmem>>, vector<1x4x4xf32>
    %6 = vector.shape_cast %5 : vector<1x4x4xf32> to vector<4x4xf32>
    %cst_7 = arith.constant dense<0.000000e+00> : vector<128x4xf32>
    %7 = tpu.matmul %4, %6, %cst_7 {dimension_numbers = #tpu.dot_dimension_numbers<[1], [0], [0], [1], [0, 0, 1, 1], [], []>} : vector<128x4xf32>, vector<4x4xf32>, vector<128x4xf32> -> vector<128x4xf32>
    %8 = arith.addf %2, %7 : vector<128x4xf32>
    %9 = vector.extract_strided_slice %1 {offsets = [0, 1, 0], sizes = [8, 16, 4], strides = [1, 1, 1]} : vector<10x18x4xf32> to vector<8x16x4xf32>
    %10 = vector.shape_cast %9 : vector<8x16x4xf32> to vector<128x4xf32>
    %c1 = arith.constant 1 : index
    %c0_8 = arith.constant 0 : index
    %c0_9 = arith.constant 0 : index
    %11 = vector.load %arg3[%c1, %c0_8, %c0_9] : memref<9x4x4xf32, #tpu.memory_space<vmem>>, vector<1x4x4xf32>
    %12 = vector.shape_cast %11 : vector<1x4x4xf32> to vector<4x4xf32>
    %cst_10 = arith.constant dense<0.000000e+00> : vector<128x4xf32>
    %13 = tpu.matmul %10, %12, %cst_10 {dimension_numbers = #tpu.dot_dimension_numbers<[1], [0], [0], [1], [0, 0, 1, 1], [], []>} : vector<128x4xf32>, vector<4x4xf32>, vector<128x4xf32> -> vector<128x4xf32>
    %14 = arith.addf %8, %13 : vector<128x4xf32>
    %15 = vector.extract_strided_slice %1 {offsets = [0, 2, 0], sizes = [8, 16, 4], strides = [1, 1, 1]} : vector<10x18x4xf32> to vector<8x16x4xf32>
    %16 = vector.shape_cast %15 : vector<8x16x4xf32> to vector<128x4xf32>
    %c2 = arith.constant 2 : index
    %c0_11 = arith.constant 0 : index
    %c0_12 = arith.constant 0 : index
    %17 = vector.load %arg3[%c2, %c0_11, %c0_12] : memref<9x4x4xf32, #tpu.memory_space<vmem>>, vector<1x4x4xf32>
    %18 = vector.shape_cast %17 : vector<1x4x4xf32> to vector<4x4xf32>
    %cst_13 = arith.constant dense<0.000000e+00> : vector<128x4xf32>
    %19 = tpu.matmul %16, %18, %cst_13 {dimension_numbers = #tpu.dot_dimension_numbers<[1], [0], [0], [1], [0, 0, 1, 1], [], []>} : vector<128x4xf32>, vector<4x4xf32>, vector<128x4xf32> -> vector<128x4xf32>
    %20 = arith.addf %14, %19 : vector<128x4xf32>
    %21 = vector.extract_strided_slice %1 {offsets = [1, 0, 0], sizes = [8, 16, 4], strides = [1, 1, 1]} : vector<10x18x4xf32> to vector<8x16x4xf32>
    %22 = vector.shape_cast %21 : vector<8x16x4xf32> to vector<128x4xf32>
    %c3 = arith.constant 3 : index
    %c0_14 = arith.constant 0 : index
    %c0_15 = arith.constant 0 : index
    %23 = vector.load %arg3[%c3, %c0_14, %c0_15] : memref<9x4x4xf32, #tpu.memory_space<vmem>>, vector<1x4x4xf32>
    %24 = vector.shape_cast %23 : vector<1x4x4xf32> to vector<4x4xf32>
    %cst_16 = arith.constant dense<0.000000e+00> : vector<128x4xf32>
    %25 = tpu.matmul %22, %24, %cst_16 {dimension_numbers = #tpu.dot_dimension_numbers<[1], [0], [0], [1], [0, 0, 1, 1], [], []>} : vector<128x4xf32>, vector<4x4xf32>, vector<128x4xf32> -> vector<128x4xf32>
    %26 = arith.addf %20, %25 : vector<128x4xf32>
    %27 = vector.extract_strided_slice %1 {offsets = [1, 1, 0], sizes = [8, 16, 4], strides = [1, 1, 1]} : vector<10x18x4xf32> to vector<8x16x4xf32>
    %28 = vector.shape_cast %27 : vector<8x16x4xf32> to vector<128x4xf32>
    %c4 = arith.constant 4 : index
    %c0_17 = arith.constant 0 : index
    %c0_18 = arith.constant 0 : index
    %29 = vector.load %arg3[%c4, %c0_17, %c0_18] : memref<9x4x4xf32, #tpu.memory_space<vmem>>, vector<1x4x4xf32>
    %30 = vector.shape_cast %29 : vector<1x4x4xf32> to vector<4x4xf32>
    %cst_19 = arith.constant dense<0.000000e+00> : vector<128x4xf32>
    %31 = tpu.matmul %28, %30, %cst_19 {dimension_numbers = #tpu.dot_dimension_numbers<[1], [0], [0], [1], [0, 0, 1, 1], [], []>} : vector<128x4xf32>, vector<4x4xf32>, vector<128x4xf32> -> vector<128x4xf32>
    %32 = arith.addf %26, %31 : vector<128x4xf32>
    %33 = vector.extract_strided_slice %1 {offsets = [1, 2, 0], sizes = [8, 16, 4], strides = [1, 1, 1]} : vector<10x18x4xf32> to vector<8x16x4xf32>
    %34 = vector.shape_cast %33 : vector<8x16x4xf32> to vector<128x4xf32>
    %c5 = arith.constant 5 : index
    %c0_20 = arith.constant 0 : index
    %c0_21 = arith.constant 0 : index
    %35 = vector.load %arg3[%c5, %c0_20, %c0_21] : memref<9x4x4xf32, #tpu.memory_space<vmem>>, vector<1x4x4xf32>
    %36 = vector.shape_cast %35 : vector<1x4x4xf32> to vector<4x4xf32>
    %cst_22 = arith.constant dense<0.000000e+00> : vector<128x4xf32>
    %37 = tpu.matmul %34, %36, %cst_22 {dimension_numbers = #tpu.dot_dimension_numbers<[1], [0], [0], [1], [0, 0, 1, 1], [], []>} : vector<128x4xf32>, vector<4x4xf32>, vector<128x4xf32> -> vector<128x4xf32>
    %38 = arith.addf %32, %37 : vector<128x4xf32>
    %39 = vector.extract_strided_slice %1 {offsets = [2, 0, 0], sizes = [8, 16, 4], strides = [1, 1, 1]} : vector<10x18x4xf32> to vector<8x16x4xf32>
    %40 = vector.shape_cast %39 : vector<8x16x4xf32> to vector<128x4xf32>
    %c6 = arith.constant 6 : index
    %c0_23 = arith.constant 0 : index
    %c0_24 = arith.constant 0 : index
    %41 = vector.load %arg3[%c6, %c0_23, %c0_24] : memref<9x4x4xf32, #tpu.memory_space<vmem>>, vector<1x4x4xf32>
    %42 = vector.shape_cast %41 : vector<1x4x4xf32> to vector<4x4xf32>
    %cst_25 = arith.constant dense<0.000000e+00> : vector<128x4xf32>
    %43 = tpu.matmul %40, %42, %cst_25 {dimension_numbers = #tpu.dot_dimension_numbers<[1], [0], [0], [1], [0, 0, 1, 1], [], []>} : vector<128x4xf32>, vector<4x4xf32>, vector<128x4xf32> -> vector<128x4xf32>
    %44 = arith.addf %38, %43 : vector<128x4xf32>
    %45 = vector.extract_strided_slice %1 {offsets = [2, 1, 0], sizes = [8, 16, 4], strides = [1, 1, 1]} : vector<10x18x4xf32> to vector<8x16x4xf32>
    %46 = vector.shape_cast %45 : vector<8x16x4xf32> to vector<128x4xf32>
    %c7 = arith.constant 7 : index
    %c0_26 = arith.constant 0 : index
    %c0_27 = arith.constant 0 : index
    %47 = vector.load %arg3[%c7, %c0_26, %c0_27] : memref<9x4x4xf32, #tpu.memory_space<vmem>>, vector<1x4x4xf32>
    %48 = vector.shape_cast %47 : vector<1x4x4xf32> to vector<4x4xf32>
    %cst_28 = arith.constant dense<0.000000e+00> : vector<128x4xf32>
    %49 = tpu.matmul %46, %48, %cst_28 {dimension_numbers = #tpu.dot_dimension_numbers<[1], [0], [0], [1], [0, 0, 1, 1], [], []>} : vector<128x4xf32>, vector<4x4xf32>, vector<128x4xf32> -> vector<128x4xf32>
    %50 = arith.addf %44, %49 : vector<128x4xf32>
    %51 = vector.extract_strided_slice %1 {offsets = [2, 2, 0], sizes = [8, 16, 4], strides = [1, 1, 1]} : vector<10x18x4xf32> to vector<8x16x4xf32>
    %52 = vector.shape_cast %51 : vector<8x16x4xf32> to vector<128x4xf32>
    %c8 = arith.constant 8 : index
    %c0_29 = arith.constant 0 : index
    %c0_30 = arith.constant 0 : index
    %53 = vector.load %arg3[%c8, %c0_29, %c0_30] : memref<9x4x4xf32, #tpu.memory_space<vmem>>, vector<1x4x4xf32>
    %54 = vector.shape_cast %53 : vector<1x4x4xf32> to vector<4x4xf32>
    %cst_31 = arith.constant dense<0.000000e+00> : vector<128x4xf32>
    %55 = tpu.matmul %52, %54, %cst_31 {dimension_numbers = #tpu.dot_dimension_numbers<[1], [0], [0], [1], [0, 0, 1, 1], [], []>} : vector<128x4xf32>, vector<4x4xf32>, vector<128x4xf32> -> vector<128x4xf32>
    %56 = arith.addf %50, %55 : vector<128x4xf32>
    %c0_32 = arith.constant 0 : index
    %c0_33 = arith.constant 0 : index
    %57 = vector.load %arg4[%c0_32, %c0_33] : memref<1x4xf32, #tpu.memory_space<vmem>>, vector<1x4xf32>
    %58 = vector.broadcast %57 : vector<1x4xf32> to vector<128x4xf32>
    %59 = arith.addf %56, %58 : vector<128x4xf32>
    %cst_34 = arith.constant 0.000000e+00 : f32
    %60 = vector.broadcast %cst_34 : f32 to vector<128x4xf32>
    %61 = arith.maximumf %59, %60 : vector<128x4xf32>
    %c0_35 = arith.constant 0 : index
    %c0_36 = arith.constant 0 : index
    %62 = vector.load %arg5[%c0_35, %c0_36] : memref<4x128xf32, #tpu.memory_space<vmem>>, vector<4x128xf32>
    %cst_37 = arith.constant dense<0.000000e+00> : vector<128x128xf32>
    %63 = tpu.matmul %61, %62, %cst_37 {dimension_numbers = #tpu.dot_dimension_numbers<[1], [0], [0], [1], [0, 0, 1, 1], [], []>} : vector<128x4xf32>, vector<4x128xf32>, vector<128x128xf32> -> vector<128x128xf32>
    %c0_38 = arith.constant 0 : index
    %c0_39 = arith.constant 0 : index
    %64 = vector.load %arg6[%c0_38, %c0_39] : memref<1x128xf32, #tpu.memory_space<vmem>>, vector<1x128xf32>
    %65 = vector.broadcast %64 : vector<1x128xf32> to vector<128x128xf32>
    %66 = arith.addf %63, %65 : vector<128x128xf32>
    %c0_40 = arith.constant 0 : index
    %c0_41 = arith.constant 0 : index
    %c0_42 = arith.constant 0 : index
    %67 = vector.load %arg7[%c0_40, %c0_41, %c0_42] : memref<1x128x128xf32, #tpu.memory_space<vmem>>, vector<1x128x128xf32>
    %68 = vector.shape_cast %67 : vector<1x128x128xf32> to vector<128x128xf32>
    %69 = vector.shape_cast %66 : vector<128x128xf32> to vector<1x128x128xf32>
    tpu.vector_store %arg7[%c0_40, %c0_41, %c0_42], %69 {strides = array<i32>} : memref<1x128x128xf32, #tpu.memory_space<vmem>>, vector<1x128x128xf32>,
    return
  }
  func.func @transform_0(%arg0: i32, %arg1: i32) -> (i32, i32, i32, i32, i32) {
    %c0_i32 = arith.constant 0 : i32
    %c0_i32_0 = arith.constant 0 : i32
    %c0_i32_1 = arith.constant 0 : i32
    %c0_i32_2 = arith.constant 0 : i32
    return %arg0, %arg1, %c0_i32, %c0_i32_0, %c0_i32_1 : i32, i32, i32, i32, i32
  }
  func.func @transform_1(%arg0: i32, %arg1: i32) -> (i32, i32, i32) {
    %c0_i32 = arith.constant 0 : i32
    %c0_i32_0 = arith.constant 0 : i32
    %c0_i32_1 = arith.constant 0 : i32
    %c0_i32_2 = arith.constant 0 : i32
    return %c0_i32, %c0_i32_0, %c0_i32_1 : i32, i32, i32
  }
  func.func @transform_2(%arg0: i32, %arg1: i32) -> (i32, i32) {
    %c0_i32 = arith.constant 0 : i32
    %c0_i32_0 = arith.constant 0 : i32
    %c0_i32_1 = arith.constant 0 : i32
    return %c0_i32, %c0_i32_0 : i32, i32
  }
  func.func @transform_3(%arg0: i32, %arg1: i32) -> (i32, i32) {
    %c0_i32 = arith.constant 0 : i32
    %c0_i32_0 = arith.constant 0 : i32
    %c0_i32_1 = arith.constant 0 : i32
    return %c0_i32, %c0_i32_0 : i32, i32
  }
  func.func @transform_4(%arg0: i32, %arg1: i32) -> (i32, i32) {
    %c0_i32 = arith.constant 0 : i32
    %c0_i32_0 = arith.constant 0 : i32
    %c0_i32_1 = arith.constant 0 : i32
    return %c0_i32, %c0_i32_0 : i32, i32
  }
  func.func @transform_5(%arg0: i32, %arg1: i32) -> (i32, i32, i32) {
    %c0_i32 = arith.constant 0 : i32
    %c0_i32_0 = arith.constant 0 : i32
    return %arg0, %arg1, %c0_i32 : i32, i32, i32
  }
}

</mosaic_0001>

<bundles_post_ra>
// kernel: tpu_custom_call.1
= control target key start
LH: loop header
LB: loop body
LE: loop exit
PB: predicated region body
PF: predicated region fallthrough
CT: control target
= control target key end

     0   :  { %10 = vsyncpa [#allocation3], 0  ;;  %s4204_s0 = inlined_call_operand.vmem [shape: f32[2,2,10,18,4], index: 0, kind: input, shape index: {}]   ;;  %s4205_s1 = inlined_call_operand.vmem [shape: f32[9,4,4], index: 1, kind: input, shape index: {}]   ;;  %s4206_s2 = inlined_call_operand.vmem [shape: f32[1,4], index: 2, kind: input, shape index: {}]   ;;  %s4207_s3 = inlined_call_operand.vmem [shape: f32[4,128], index: 3, kind: input, shape index: {}]   ;;  %s4208_s4 = inlined_call_operand.vmem [shape: f32[1,128], index: 4, kind: input, shape index: {}]   ;;  %s4209_s5 = inlined_call_operand.hbm [shape: f32[2,256,128], index: 5, kind: output, shape index: {}]  }
   0x1   :  { %12 = vsyncpa [#allocation3 + $0x1], 0  ;;  %s3182_s18 = smov 0   ;;  %s3184_s19 = smov 0  }
   0x2   :  { %s3186_s20 = smov 0   ;;  %s3188_s21 = smov 0  }
   0x3   :  { %s3190_s22 = smov 0   ;;  %s3192_s23 = smov 0  }
   0x4   :  { %s3194_s24 = smov 0   ;;  %s3196_s25 = smov 0  }
   0x5 LB: > { %s2357_s26 = sadd.s32 4294967295, %s3147_s25   ;;  %s2358_s27 = sadd.s32 4294967294, %s3147_s25   ;;  %s3147_s25 = sphi %s3196_s25, %s18_s25   ;;  %s3143_s24 = sphi %s3194_s24, %s4279_s24   ;;  %s3139_s23 = sphi %s3192_s23, %s4278_s23   ;;  %s3135_s22 = sphi %s3190_s22, %s4277_s22   ;;  %s3131_s21 = sphi %s3188_s21, %s4276_s21   ;;  %s3127_s20 = sphi %s3186_s20, %s4275_s20   ;;  %s3123_s19 = sphi %s3184_s19, %s4274_s19   ;;  %s3119_s18 = sphi %s3182_s18, %s4273_s18  }
   0x6   : > { %s27_s28 = sadd.s32 1, %s3139_s23  ;;  %s30_s29 = sadd.s32 1, %s3143_s24 }
   0x7   : > { %p28_p0 = scmp.ge.s32.totalorder %s27_s28, 2  ;;  %p161_p1 = scmp.ne.s32.totalorder %s3127_s20, %s3123_s19 }
   0x8   : > { %p162_p2 = scmp.eq.s32.totalorder %s2357_s26, 3  ;;  %p167_p5 = scmp.ne.s32.totalorder %s3123_s19, %s3119_s18 }
   0x9   : > { %s4281_s28 = smov (%p28_p0, %s27_s28), 0  ;;  %s4283_s29 = smov (!%p28_p0, %s30_s29), %s3143_s24 }
   0xa   : > { %s147_s30 = ssub.s32 %s3139_s23, %s4281_s28  ;;  %p3233_p3 = por %p162_p2, %p161_p1 }
   0xb   : > { %p32_p4 = scmp.ge.s32.totalorder %s4283_s29, 2  ;;  %p168_p6 = scmp.eq.s32.totalorder %s2358_s27, 3 }
   0xc   : > { %p2361_p7 = scmp.ge.s32.totalorder %s3147_s25, 1  ;;  %p210_p9 = scmp.lt.s32.totalorder %s3147_s25, 5 }
   0xd   : > { %s4285_s29 = smov (%p32_p4, %s4283_s29), 0  ;;  %p3242_p8 = por %p168_p6, %p167_p5 }
   0xe   : > { %4212 = sst [smem:[#allocation5_spill]] %s4285_s29  ;;  %s146_s8 = ssub.s32 %s3143_s24, %s4285_s29 }
   0xf   : > { %s151_s9 = sadd.s32 1, %s3127_s20  ;;  %s148_s10 = sor.u32 %s147_s30, %s146_s8 }
  0x10   : > { %p211_p10 = pnand %p2361_p7, %p210_p9  ;;  %p149_p11 = scmp.eq.s32.totalorder %s148_s10, 0 }
  0x12   : > { %s3251_s11 = scalar_select %p149_p11, %s3127_s20, %s151_s9  }
  0x13   : > { %214 = sbr.rel (%p211_p10) target bundleno = 608 (0x260), region = 40 }
  0x18   : > { %v2364_v0 = vld [vmem:[%s4205_s1 + $0x4] sm:$0xf]  ;;  %vm383_vm0 = vcmask 1043456   ;;  %v282_v1 = vld [vmem:[%s4205_s1] sm:$0xf]  ;;  %p242_p12 = scmp.lt.s32.totalorder %s3135_s22, 1 }
  0x19   : > { %2720 = vmatprep.subr.msk.mxu0 %vm383_vm0, %v2364_v0  ;;  %2746 = vmatprep.subr.msk.mxu1 %vm383_vm0, %v282_v1  ;;  %p244_p13 = scmp.lt.s32.totalorder %s3131_s21, 1  ;;  %v2399_v2 = vld [vmem:[%s4205_s1 + $0x8] sm:$0xf]  ;;  %v2417_v3 = vld [vmem:[%s4205_s1 + $0xc] sm:$0xf]  ;;  %vm350_vm1 = vcmask 31744  }
  0x1a   : > { %2721 = vmatpush3.msk.msra.mxu0 %vm383_vm0, %v2364_v0  ;;  %s243_s26 = scalar_select %p242_p12, %s3135_s22, 1  ;;  %2747 = vmatpush3.msk.msra.mxu1 %vm383_vm0, %v282_v1  ;;  %v3283_v4 = vld [vmem:[%s4205_s1 + $0x14] sm:$0xf]  ;;  %vm307_vm2 = vcmask 1046528   ;;  %v3342_v27 = vld [vmem:[%s4205_s1 + $0x10] sm:$0xf] }
  0x1b   : > { %s245_s8 = scalar_select %p244_p13, %s3131_s21, 1  ;;  %2772 = vmatprep.subr.msk.mxu0 %vm383_vm0, %v2399_v2  ;;  %2798 = vmatprep.subr.msk.mxu1 %vm383_vm0, %v2417_v3  ;;  %vm712_vm3 = vcmask 1045504  }
  0x1c   : > { %s2981_s9 = smul.u32 60, %s243_s26  ;;  %s239_s17 = sand.u32 1, %s3123_s19  }
  0x1d   : > { %s2980_s10 = smul.u32 30, %s245_s8  ;;  %s2362_s29 = sshll.u32 %s239_s17, 7 }
  0x1e   : > { %s4123_s30 = scalar_lea.vmem [#allocation2], %s2362_s29  ;;  %s2545_s8 = sshll.u32 %s3131_s21, 4 }
  0x1f   : > { %s248_s12 = sadd.s32 %s2981_s9, %s2980_s10  ;;  %s2546_s9 = sshll.u32 %s3135_s22, 5 }
  0x20   : > { %s2363_s13 = sshll.u32 %s248_s12, 3  ;;  %s2269_s10 = sadd.s32 %s2546_s9, %s2545_s8 }
  0x21   : > { %s3278_s16 = scalar_lea.vmem %s4204_s0, %s2363_s13  ;;  %s2547_s12 = sshll.u32 %s2269_s10, 7 }
  0x22   : > { %v3286_v5 = vld [vmem:[%s3278_s16] sm:$0xff]  ;;  %v3289_v6 = vld [vmem:[%s3278_s16 + $0x8] sm:$0xff]  ;;  %v3292_v7 = vld [vmem:[%s3278_s16 + $0x10] sm:$0x3]  ;;  %s2272_s13 = sshll.u32 %s4123_s30, 4  ;;  %s4145_s14 = scalar_lea.hbm %s4209_s5, %s2547_s12  ;;  %s4147_s13 = int_to_ptr.vmem [resolvable:$true] %s2272_s13 }
  0x23   : > { %v308_v8 = vrot.slane %v3286_v5, 1  ;;  %v309_v9 = vrot.slane %v3289_v6, 1  ;;  %2748 = vmatprep.mubr.msk.f32.mxu1 %vm350_vm1, %v3286_v5  ;;  %v311_v10 = vrot.slane %v3292_v7, 1  ;;  %v3300_v11 = vld [vmem:[%s3278_s16 + $0x18] sm:$0xff]  ;;  %v3303_v12 = vld [vmem:[%s3278_s16 + $0x20] sm:$0xff]  ;;  %v3313_v16 = vld [vmem:[%s3278_s16 + $0x30] sm:$0xff] }
  0x24   : > { %2749 = vmatmul.mubr.msk.f32.vlgmr.msra.gmra.mxu1 %vm350_vm1, %v3289_v6  ;;  %v313_v13 = vrot.slane %v3300_v11, 1  ;;  %v314_v14 = vrot.slane %v3303_v12, 1  ;;  %v3310_v15 = vld [vmem:[%s3278_s16 + $0x28] sm:$0x3]  ;;  %v3316_v17 = vld [vmem:[%s3278_s16 + $0x38] sm:$0xff]  ;;  %v318_v21 = vrot.slane %v3313_v16, 1 }
  0x25   : > { %v310_v18 = vsel %vm307_vm2, %v308_v8, %v309_v9  ;;  %v312_v19 = vsel %vm307_vm2, %v309_v9, %v311_v10  ;;  %2751 = vmatprep.mubr.msk.f32.mxu1 %vm350_vm1, %v3300_v11  ;;  %v316_v20 = vrot.slane %v3310_v15, 1  ;;  %v3325_v22 = vld [vmem:[%s3278_s16 + $0x40] sm:$0x3]  ;;  %2799 = vmatpush3.msk.msra.mxu1 %vm383_vm0, %v2417_v3  ;;  %v319_v24 = vrot.slane %v3316_v17, 1  ;;  %v3334_v25 = vld [vmem:[%s3278_s16 + $0x48] sm:$0xff]  ;;  %v3337_v26 = vld [vmem:[%s3278_s16 + $0x50] sm:$0xff] }
  0x26   : > { %2722 = vmatprep.mubr.msk.f32.mxu0 %vm350_vm1, %v310_v18  ;;  %v3330_v23 = vsel %vm307_vm2, %v313_v13, %v314_v14  ;;  %2850 = vmatprep.subr.msk.mxu1 %vm383_vm0, %v3283_v4  ;;  %v321_v29 = vrot.slane %v3325_v22, 1  ;;  %v323_v31 = vrot.slane %v3334_v25, 1  ;;  %v324_v32 = vrot.slane %v3337_v26, 1  ;;  %v3362_v33 = vld [vmem:[%s3278_s16 + $0x58] sm:$0x3]  ;;  %v3369_v34 = vld [vmem:[%s3278_s16 + $0x60] sm:$0xff] }
  0x27   : > { %2723 = vmatmul.mubr.msk.f32.vlgmr.msra.gmra.mxu0 %vm350_vm1, %v312_v19  ;;  %v3351_v28 = vsel %vm307_vm2, %v314_v14, %v316_v20  ;;  %v3357_v30 = vsel %vm307_vm2, %v318_v21, %v319_v24  ;;  %v3372_v35 = vld [vmem:[%s3278_s16 + $0x68] sm:$0xff]  ;;  %v326_v37 = vrot.slane %v3362_v33, 1  ;;  %v328_v39 = vrot.slane %v3369_v34, 1  ;;  %v3390_v41 = vld [vmem:[%s3278_s16 + $0x70] sm:$0x3]  ;;  %v3395_v42 = vld [vmem:[%s3278_s16 + $0x78] sm:$0xff] }
  0x28   : > { %2773 = vmatpush3.msk.msra.mxu0 %vm383_vm0, %v2399_v2  ;;  %2725 = vmatprep.mubr.msk.f32.mxu0 %vm350_vm1, %v3330_v23  ;;  %v3379_v36 = vsel %vm307_vm2, %v319_v24, %v321_v29  ;;  %v3385_v38 = vsel %vm307_vm2, %v323_v31, %v324_v32  ;;  %v329_v40 = vrot.slane %v3372_v35, 1  ;;  %v3398_v43 = vld [vmem:[%s3278_s16 + $0x80] sm:$0xff]  ;;  %v331_v45 = vrot.slane %v3390_v41, 1  ;;  %v3416_v49 = vld [vmem:[%s3278_s16 + $0x88] sm:$0x3]  ;;  %v3421_v50 = vld [vmem:[%s3278_s16 + $0x90] sm:$0xff] }
  0x29   : > { %2752 = vmatmul.mubr.msk.f32.gmra.mxu1 %vm350_vm1, %v3303_v12  ;;  %2824 = vmatprep.subr.msk.mxu0 %vm383_vm0, %v3342_v27  ;;  %v3405_v44 = vsel %vm307_vm2, %v324_v32, %v326_v37  ;;  %v333_v47 = vrot.slane %v3395_v42, 1  ;;  %v334_v48 = vrot.slane %v3398_v43, 1  ;;  %v3424_v51 = vld [vmem:[%s3278_s16 + $0x98] sm:$0xff]  ;;  %v336_v53 = vrot.slane %v3416_v49, 1  ;;  %v3435_v54 = vld [vmem:[%s3278_s16 + $0xa0] sm:$0x3] }
  0x2a   : > { %2754 = vmatprep.mubr.msk.f32.mxu1 %vm350_vm1, %v3313_v16  ;;  %v3411_v46 = vsel %vm307_vm2, %v328_v39, %v329_v40  ;;  %v3431_v52 = vsel %vm307_vm2, %v329_v40, %v331_v45  ;;  %v338_v56 = vrot.slane %v3421_v50, 1  ;;  %v339_v57 = vrot.slane %v3424_v51, 1  ;;  %v3445_v58 = vld [vmem:[%s3278_s16 + $0xa8] sm:$0xff]  ;;  %v3448_v59 = vld [vmem:[%s3278_s16 + $0xd0] sm:$0x3]  ;;  %v3459_v62 = vld [vmem:[%s3278_s16 + $0xd8] sm:$0xff] }
  0x2b   : > { %2726 = vmatmul.mubr.msk.f32.gmra.mxu0 %vm350_vm1, %v3351_v28  ;;  %v3440_v55 = vsel %vm307_vm2, %v333_v47, %v334_v48  ;;  %v3453_v60 = vld [vmem:[%s3278_s16 + $0xb0] sm:$0xff]  ;;  %v3456_v61 = vld [vmem:[%s3278_s16 + $0xc8] sm:$0xff]  ;;  %v3465_v0 = vld [vmem:[%s3278_s16 + $0xe0] sm:$0xff]  ;;  %v3470_v1 = vsel %vm307_vm2, %v334_v48, %v336_v53  ;;  %v341_v2 = vrot.slane %v3435_v54, 1  ;;  %v1127_v3 = vrot.slane %v3448_v59, 1  ;;  %s4153_s15 = scalar_lea.sflag [#allocation3], %s239_s17 }
  0x2c   : > { %2728 = vmatprep.mubr.msk.f32.mxu0 %vm350_vm1, %v3357_v30  ;;  %v1125_v63 = vrot.slane %v3456_v61, 1  ;;  %v281_v8 = vld [vmem:[%s3278_s16 + $0xe8] sm:$0x3]  ;;  %v3478_v9 = vsel %vm307_vm2, %v338_v56, %v339_v57  ;;  %v343_v10 = vrot.slane %v3445_v58, 1  ;;  %v344_v13 = vrot.slane %v3453_v60, 1  ;;  %s3149_s29 = smov [#allocation2]  }
  0x2d   : > { %2755 = vmatmul.mubr.msk.f32.gmra.mxu1 %vm350_vm1, %v3316_v17  ;;  %v3483_v14 = vld [vmem:[%s3278_s16 + $0xb8] sm:$0x3]  ;;  %v1647_v18 = vrot.slane %v3459_v62, 1  ;;  %v1648_v20 = vrot.slane %v3465_v0, 1  ;;  %v1822_v21 = vrot.slane %v3459_v62, 2  ;;  %v1823_v24 = vrot.slane %v3465_v0, 2 }
  0x2e   : > { %2757 = vmatprep.mubr.msk.f32.mxu1 %vm350_vm1, %v3334_v25  ;;  %v3491_v19 = vsel %vm307_vm2, %v1125_v63, %v1127_v3  ;;  %v1650_v29 = vrot.slane %v281_v8, 1  ;;  %v3501_v31 = vsel %vm307_vm2, %v339_v57, %v341_v2  ;;  %v346_v32 = vrot.slane %v3483_v14, 1  ;;  %s3059_s26 = sshll.u32 %s3149_s29, 4  ;;  %s3060_s26 = int_to_ptr.vmem [resolvable:$false] %s3059_s26 }
  0x2f   : > { %2729 = vmatmul.mubr.msk.f32.gmra.mxu0 %vm350_vm1, %v3379_v36  ;;  %v3505_v37 = vsel %vm307_vm2, %v1647_v18, %v1648_v20  ;;  %v3510_v39 = vsel %vm307_vm2, %v343_v10, %v344_v13  ;;  %v713_v40 = vrot.slane %v3286_v5, 2  ;;  %v714_v45 = vrot.slane %v3289_v6, 2  ;;  %v3548_v10 = vld [vmem:[%s4205_s1 + $0x1c] sm:$0xf]  ;;  %s3061_s27 = scalar_lea.vmem %s3060_s26, 4096  ;;  %p3062_p4 = scmp.lt.s32.totalorder %s4147_s13, %s3060_s26 }
  0x30   : > { %2731 = vmatprep.mubr.msk.f32.mxu0 %vm350_vm1, %v3385_v38  ;;  %v3515_v47 = vsel %vm307_vm2, %v1648_v20, %v1650_v29  ;;  %v3522_v48 = vsel %vm712_vm3, %v1822_v21, %v1823_v24  ;;  %v716_v53 = vrot.slane %v3292_v7, 2  ;;  %v3528_v5 = vsel %vm307_vm2, %v344_v13, %v346_v32 }
  0x31   : > { %2758 = vmatmul.mubr.msk.f32.gmra.mxu1 %vm350_vm1, %v3337_v26  ;;  %v1825_v6 = vrot.slane %v281_v8, 2  ;;  %v715_v56 = vsel %vm712_vm3, %v713_v40, %v714_v45  ;;  %v718_v57 = vrot.slane %v3300_v11, 2  ;;  %v719_v2 = vrot.slane %v3303_v12, 2 }
  0x32   : > { %2760 = vmatprep.mubr.msk.f32.mxu1 %vm350_vm1, %v3369_v34  ;;  %v717_v3 = vsel %vm712_vm3, %v714_v45, %v716_v53  ;;  %v721_v8 = vrot.slane %v3310_v15, 2  ;;  %v723_v13 = vrot.slane %v3313_v16, 2  ;;  %v724_v18 = vrot.slane %v3316_v17, 2  ;;  %v3564_v15 = vld [vmem:[%s4205_s1 + $0x18] sm:$0xf] }
  0x33   : > { %2732 = vmatmul.mubr.msk.f32.gmra.mxu0 %vm350_vm1, %v3405_v44  ;;  %v3538_v7 = vsel %vm712_vm3, %v1823_v24, %v1825_v6  ;;  %v728_v21 = vrot.slane %v3334_v25, 2  ;;  %v729_v24 = vrot.slane %v3337_v26, 2  ;;  %v733_v32 = vrot.slane %v3369_v34, 2 }
  0x34   : > { %2734 = vmatprep.mubr.msk.f32.mxu0 %vm350_vm1, %v3411_v46  ;;  %v3578_v20 = vsel %vm712_vm3, %v723_v13, %v724_v18  ;;  %v734_v40 = vrot.slane %v3372_v35, 2  ;;  %v736_v45 = vrot.slane %v3390_v41, 2  ;;  %v738_v6 = vrot.slane %v3395_v42, 2 }
  0x35   : > { %2761 = vmatmul.mubr.msk.f32.gmra.mxu1 %vm350_vm1, %v3372_v35  ;;  %v3596_v29 = vsel %vm712_vm3, %v728_v21, %v729_v24  ;;  %v746_v13 = vrot.slane %v3435_v54, 2  ;;  %v749_v21 = vrot.slane %v3453_v60, 2 }
  0x36   : > { %2763 = vmatprep.mubr.msk.f32.mxu1 %vm350_vm1, %v3395_v42  ;;  %v3613_v53 = vsel %vm712_vm3, %v733_v32, %v734_v40  ;;  %v3624_v41 = vsel %vm712_vm3, %v734_v40, %v736_v45 }
  0x37   : > { %2735 = vmatmul.mubr.msk.f32.gmra.mxu0 %vm350_vm1, %v3431_v52 }
  0x38   : > { %2737 = vmatprep.mubr.msk.f32.mxu0 %vm350_vm1, %v3440_v55 }
  0x39   : > { %2764 = vmatmul.mubr.msk.f32.gmra.mxu1 %vm350_vm1, %v3398_v43 }
  0x3a   : > { %2766 = vmatprep.mubr.msk.f32.mxu1 %vm350_vm1, %v3421_v50 }
  0x3b   : > { %2738 = vmatmul.mubr.msk.f32.gmra.mxu0 %vm350_vm1, %v3470_v1 }
  0x3c   : > { %2740 = vmatprep.mubr.msk.f32.mxu0 %vm350_vm1, %v3478_v9 }
  0x3d   : > { %2767 = vmatmul.mubr.msk.f32.gmra.mxu1 %vm350_vm1, %v3424_v51 }
  0x3e   : > { %2769 = vmatprep.mubr.msk.f32.mxu1 %vm350_vm1, %v3445_v58 }
  0x3f   : > { %2741 = vmatmul.mubr.msk.f32.gmra.mxu0 %vm350_vm1, %v3501_v31 }
  0x40   : > { %2743 = vmatprep.mubr.msk.f32.mxu0 %vm350_vm1, %v3510_v39 }
  0x41   : > { %2770 = vmatmul.mubr.msk.f32.gmra.mxu1 %vm350_vm1, %v3453_v60 }
  0x42   : > { %2800 = vmatprep.mubr.msk.f32.mxu1 %vm350_vm1, %v3300_v11  ;;  %v3553_v11 = vsel %vm712_vm3, %v718_v57, %v719_v2  ;;  %v741_v57 = vrot.slane %v3416_v49, 2 }
  0x43   : > { %2744 = vmatmul.mubr.msk.f32.gmra.mxu0 %vm350_vm1, %v3528_v5 }
  0x44   : > { %2774 = vmatprep.mubr.msk.f32.mxu0 %vm350_vm1, %v715_v56  ;;  %v739_v56 = vrot.slane %v3398_v43, 2 }
  0x45   : > { %2801 = vmatmul.mubr.msk.f32.vlgmr.msra.gmra.mxu1 %vm350_vm1, %v3303_v12  ;;  %v722_v12 = vsel %vm712_vm3, %v719_v2, %v721_v8  ;;  %v744_v8 = vrot.slane %v3424_v51, 2 }
  0x46   : > { %2803 = vmatprep.mubr.msk.f32.mxu1 %vm350_vm1, %v3313_v16  ;;  %2851 = vmatpush3.msk.msra.mxu1 %vm383_vm0, %v3283_v4  ;;  %v726_v4 = vrot.slane %v3325_v22, 2  ;;  %v3630_v2 = vsel %vm712_vm3, %v738_v6, %v739_v56  ;;  %v3641_v49 = vsel %vm712_vm3, %v739_v56, %v741_v57 }
  0x47   : > { %2775 = vmatmul.mubr.msk.f32.vlgmr.msra.gmra.mxu0 %vm350_vm1, %v717_v3  ;;  %2902 = vmatprep.subr.msk.mxu1 %vm383_vm0, %v3548_v10  ;;  %v743_v3 = vrot.slane %v3421_v50, 2  ;;  %v3661_v54 = vsel %vm712_vm3, %v744_v8, %v746_v13 }
  0x48   : > { %2825 = vmatpush3.msk.msra.mxu0 %vm383_vm0, %v3342_v27  ;;  %2777 = vmatprep.mubr.msk.f32.mxu0 %vm350_vm1, %v3553_v11  ;;  %v3590_v22 = vsel %vm712_vm3, %v724_v18, %v726_v4  ;;  %v731_v27 = vrot.slane %v3362_v33, 2  ;;  %v748_v4 = vrot.slane %v3445_v58, 2 }
  0x49   : > { %2804 = vmatmul.mubr.msk.f32.gmra.mxu1 %vm350_vm1, %v3316_v17  ;;  %2876 = vmatprep.subr.msk.mxu0 %vm383_vm0, %v3564_v15  ;;  %v3647_v18 = vsel %vm712_vm3, %v743_v3, %v744_v8 }
  0x4a   : > { %2806 = vmatprep.mubr.msk.f32.mxu1 %vm350_vm1, %v3334_v25  ;;  %v3607_v33 = vsel %vm712_vm3, %v729_v24, %v731_v27  ;;  %v3656_v24 = vld [vmem:[%s3278_s16 + $0xc0] sm:$0xff]  ;;  %v751_v27 = vrot.slane %v3483_v14, 2  ;;  %v3667_v32 = vsel %vm712_vm3, %v748_v4, %v749_v21  ;;  %s3055_s16 = scalar_lea.vmem %s4147_s13, 2048 }
  0x4b   : > { %2778 = vmatmul.mubr.msk.f32.gmra.mxu0 %vm350_vm1, %v722_v12  ;;  %v2507_v14 = vld [vmem:[%s4205_s1 + $0x20] sm:$0xf]  ;;  %p3056_p0 = scmp.ne.s32.totalorder %s4147_s13, %s3055_s16  ;;  %p3063_p5 = scmp.lt.s32.totalorder %s3061_s27, %s3055_s16 }
  0x4c   : > { %2780 = vmatprep.mubr.msk.f32.mxu0 %vm350_vm1, %v3578_v20  ;;  %v3676_v40 = vsel %vm712_vm3, %v749_v21, %v751_v27 }
  0x4d   : > { %2807 = vmatmul.mubr.msk.f32.gmra.mxu1 %vm350_vm1, %v3337_v26  ;;  %p3057_p1 = pnand %p3056_p0, %p3233_p3  ;;  %p3064_p6 = por %p3063_p5, %p3062_p4 }
  0x4e   : > { %2809 = vmatprep.mubr.msk.f32.mxu1 %vm350_vm1, %v3369_v34 }
  0x4f   : > { %2781 = vmatmul.mubr.msk.f32.gmra.mxu0 %vm350_vm1, %v3590_v22  ;;  %p3058_p2 = pneg %p3057_p1 }
  0x50   : > { %2783 = vmatprep.mubr.msk.f32.mxu0 %vm350_vm1, %v3596_v29 }
  0x51   : > { %2810 = vmatmul.mubr.msk.f32.gmra.mxu1 %vm350_vm1, %v3372_v35  ;;  %p3065_p7 = pnand %p3064_p6, %p3058_p2 }
  0x52   : > { %2812 = vmatprep.mubr.msk.f32.mxu1 %vm350_vm1, %v3395_v42 }
  0x53   : > { %2784 = vmatmul.mubr.msk.f32.gmra.mxu0 %vm350_vm1, %v3607_v33 }
  0x54   : > { %2786 = vmatprep.mubr.msk.f32.mxu0 %vm350_vm1, %v3613_v53 }
  0x55   : > { %2813 = vmatmul.mubr.msk.f32.gmra.mxu1 %vm350_vm1, %v3398_v43 }
  0x56   : > { %2815 = vmatprep.mubr.msk.f32.mxu1 %vm350_vm1, %v3421_v50 }
  0x57   : > { %2787 = vmatmul.mubr.msk.f32.gmra.mxu0 %vm350_vm1, %v3624_v41 }
  0x58   : > { %2789 = vmatprep.mubr.msk.f32.mxu0 %vm350_vm1, %v3630_v2 }
  0x59   : > { %2816 = vmatmul.mubr.msk.f32.gmra.mxu1 %vm350_vm1, %v3424_v51 }
  0x5a   : > { %2818 = vmatprep.mubr.msk.f32.mxu1 %vm350_vm1, %v3445_v58 }
  0x5b   : > { %2790 = vmatmul.mubr.msk.f32.gmra.mxu0 %vm350_vm1, %v3641_v49 }
  0x5c   : > { %2792 = vmatprep.mubr.msk.f32.mxu0 %vm350_vm1, %v3647_v18 }
  0x5d   : > { %2819 = vmatmul.mubr.msk.f32.gmra.mxu1 %vm350_vm1, %v3453_v60 }
  0x5e   : > { %2821 = vmatprep.mubr.msk.f32.mxu1 %vm350_vm1, %v3656_v24 }
  0x5f   : > { %2793 = vmatmul.mubr.msk.f32.gmra.mxu0 %vm350_vm1, %v3661_v54 }
  0x60   : > { %2795 = vmatprep.mubr.msk.f32.mxu0 %vm350_vm1, %v3667_v32 }
  0x61   : > { %2822 = vmatmul.mubr.msk.f32.gmra.mxu1 %vm350_vm1, %v3456_v61 }
  0x62   : > { %2852 = vmatprep.mubr.msk.f32.mxu1 %vm350_vm1, %v3553_v11  ;;  %v1302_v11 = vrot.slane %v3448_v59, 2 }
  0x63   : > { %2796 = vmatmul.mubr.msk.f32.gmra.mxu0 %vm350_vm1, %v3676_v40 }
  0x64   : > { %2826 = vmatprep.mubr.msk.f32.mxu0 %vm350_vm1, %v3330_v23  ;;  %v1299_v23 = vrot.slane %v3656_v24, 2 }
  0x65   : > { %2853 = vmatmul.mubr.msk.f32.vlgmr.msra.gmra.mxu1 %vm350_vm1, %v722_v12 }
  0x66   : > { %2855 = vmatprep.mubr.msk.f32.mxu1 %vm350_vm1, %v3578_v20  ;;  %2903 = vmatpush3.msk.msra.mxu1 %vm383_vm0, %v3548_v10  ;;  %v1124_v10 = vrot.slane %v3656_v24, 1 }
  0x67   : > { %2827 = vmatmul.mubr.msk.f32.vlgmr.msra.gmra.mxu0 %vm350_vm1, %v3351_v28  ;;  %v1300_v28 = vrot.slane %v3456_v61, 2 }
  0x68   : > { %2877 = vmatpush3.msk.msra.mxu0 %vm383_vm0, %v3564_v15  ;;  %2829 = vmatprep.mubr.msk.f32.mxu0 %vm350_vm1, %v3357_v30  ;;  %v1126_v12 = vsel %vm307_vm2, %v1124_v10, %v1125_v63 }
  0x69   : > { %2856 = vmatmul.mubr.msk.f32.gmra.mxu1 %vm350_vm1, %v3590_v22  ;;  %2928 = vmatprep.subr.msk.mxu0 %vm383_vm0, %v2507_v14  ;;  %v1301_v15 = vsel %vm712_vm3, %v1299_v23, %v1300_v28  ;;  %v1303_v45 = vsel %vm712_vm3, %v1300_v28, %v1302_v11 }
  0x6a   : > { %2858 = vmatprep.mubr.msk.f32.mxu1 %vm350_vm1, %v3596_v29 }
  0x6b   : > { %2830 = vmatmul.mubr.msk.f32.gmra.mxu0 %vm350_vm1, %v3379_v36 }
  0x6c   : > { %2832 = vmatprep.mubr.msk.f32.mxu0 %vm350_vm1, %v3385_v38 }
  0x6d   : > { %2859 = vmatmul.mubr.msk.f32.gmra.mxu1 %vm350_vm1, %v3607_v33 }
  0x6e   : > { %2861 = vmatprep.mubr.msk.f32.mxu1 %vm350_vm1, %v3613_v53 }
  0x6f   : > { %2833 = vmatmul.mubr.msk.f32.gmra.mxu0 %vm350_vm1, %v3405_v44 }
  0x70   : > { %2835 = vmatprep.mubr.msk.f32.mxu0 %vm350_vm1, %v3411_v46 }
  0x71   : > { %2862 = vmatmul.mubr.msk.f32.gmra.mxu1 %vm350_vm1, %v3624_v41 }
  0x72   : > { %2864 = vmatprep.mubr.msk.f32.mxu1 %vm350_vm1, %v3630_v2 }
  0x73   : > { %2836 = vmatmul.mubr.msk.f32.gmra.mxu0 %vm350_vm1, %v3431_v52 }
  0x74   : > { %2838 = vmatprep.mubr.msk.f32.mxu0 %vm350_vm1, %v3440_v55 }
  0x75   : > { %2865 = vmatmul.mubr.msk.f32.gmra.mxu1 %vm350_vm1, %v3641_v49 }
  0x76   : > { %2867 = vmatprep.mubr.msk.f32.mxu1 %vm350_vm1, %v3647_v18 }
  0x77   : > { %2839 = vmatmul.mubr.msk.f32.gmra.mxu0 %vm350_vm1, %v3470_v1 }
  0x78   : > { %2841 = vmatprep.mubr.msk.f32.mxu0 %vm350_vm1, %v3478_v9 }
  0x79   : > { %2868 = vmatmul.mubr.msk.f32.gmra.mxu1 %vm350_vm1, %v3661_v54 }
  0x7a   : > { %2870 = vmatprep.mubr.msk.f32.mxu1 %vm350_vm1, %v3667_v32 }
  0x7b   : > { %2842 = vmatmul.mubr.msk.f32.gmra.mxu0 %vm350_vm1, %v3501_v31 }
  0x7c   : > { %2844 = vmatprep.mubr.msk.f32.mxu0 %vm350_vm1, %v3510_v39 }
  0x7d   : > { %2871 = vmatmul.mubr.msk.f32.gmra.mxu1 %vm350_vm1, %v3676_v40 }
  0x7e   : > { %2873 = vmatprep.mubr.msk.f32.mxu1 %vm350_vm1, %v1301_v15 }
  0x7f   : > { %2845 = vmatmul.mubr.msk.f32.gmra.mxu0 %vm350_vm1, %v3528_v5 }
  0x80   : > { %2847 = vmatprep.mubr.msk.f32.mxu0 %vm350_vm1, %v1126_v12 }
  0x81   : > { %2874 = vmatmul.mubr.msk.f32.gmra.mxu1 %vm350_vm1, %v1303_v45 }
  0x82   : > { %2904 = vmatprep.mubr.msk.f32.mxu1 %vm350_vm1, %v3357_v30 }
  0x83   : > { %2848 = vmatmul.mubr.msk.f32.gmra.mxu0 %vm350_vm1, %v3491_v19 }
  0x84   : > { %2878 = vmatprep.mubr.msk.f32.mxu0 %vm350_vm1, %v3313_v16  ;;  %v2036_v16 = vld [vmem:[%s4207_s3] sm:$0xf] }
  0x85   : > { %2905 = vmatmul.mubr.msk.f32.vlgmr.msra.gmra.mxu1 %vm350_vm1, %v3379_v36  ;;  %2954 = vmatprep.subr.msk.mxu1 %vm383_vm0, %v2036_v16 }
  0x86   : > { %2907 = vmatprep.mubr.msk.f32.mxu1 %vm350_vm1, %v3385_v38  ;;  %2955 = vmatpush3.msk.msra.mxu1 %vm383_vm0, %v2036_v16 }
  0x87   : > { %2879 = vmatmul.mubr.msk.f32.vlgmr.msra.gmra.mxu0 %vm350_vm1, %v3316_v17 }
  0x88   : > { %2929 = vmatpush3.msk.msra.mxu0 %vm383_vm0, %v2507_v14  ;;  %2881 = vmatprep.mubr.msk.f32.mxu0 %vm350_vm1, %v3334_v25 }
  0x89   : > { %2908 = vmatmul.mubr.msk.f32.gmra.mxu1 %vm350_vm1, %v3405_v44 }
  0x8a   : > { %2910 = vmatprep.mubr.msk.f32.mxu1 %vm350_vm1, %v3411_v46 }
  0x8b   : > { %2882 = vmatmul.mubr.msk.f32.gmra.mxu0 %vm350_vm1, %v3337_v26 }
  0x8c   : > { %2884 = vmatprep.mubr.msk.f32.mxu0 %vm350_vm1, %v3369_v34 }
  0x8d   : > { %2911 = vmatmul.mubr.msk.f32.gmra.mxu1 %vm350_vm1, %v3431_v52 }
  0x8e   : > { %2913 = vmatprep.mubr.msk.f32.mxu1 %vm350_vm1, %v3440_v55 }
  0x8f   : > { %2885 = vmatmul.mubr.msk.f32.gmra.mxu0 %vm350_vm1, %v3372_v35 }
  0x90   : > { %2887 = vmatprep.mubr.msk.f32.mxu0 %vm350_vm1, %v3395_v42 }
  0x91   : > { %2914 = vmatmul.mubr.msk.f32.gmra.mxu1 %vm350_vm1, %v3470_v1 }
  0x92   : > { %2916 = vmatprep.mubr.msk.f32.mxu1 %vm350_vm1, %v3478_v9 }
  0x93   : > { %2888 = vmatmul.mubr.msk.f32.gmra.mxu0 %vm350_vm1, %v3398_v43 }
  0x94   : > { %2890 = vmatprep.mubr.msk.f32.mxu0 %vm350_vm1, %v3421_v50 }
  0x95   : > { %2917 = vmatmul.mubr.msk.f32.gmra.mxu1 %vm350_vm1, %v3501_v31 }
  0x96   : > { %2919 = vmatprep.mubr.msk.f32.mxu1 %vm350_vm1, %v3510_v39 }
  0x97   : > { %2891 = vmatmul.mubr.msk.f32.gmra.mxu0 %vm350_vm1, %v3424_v51 }
  0x98   : > { %2893 = vmatprep.mubr.msk.f32.mxu0 %vm350_vm1, %v3445_v58 }
  0x99   : > { %2920 = vmatmul.mubr.msk.f32.gmra.mxu1 %vm350_vm1, %v3528_v5 }
  0x9a   : > { %2922 = vmatprep.mubr.msk.f32.mxu1 %vm350_vm1, %v1126_v12 }
  0x9b   : > { %2894 = vmatmul.mubr.msk.f32.gmra.mxu0 %vm350_vm1, %v3453_v60 }
  0x9c   : > { %2896 = vmatprep.mubr.msk.f32.mxu0 %vm350_vm1, %v3656_v24 }
  0x9d   : > { %2923 = vmatmul.mubr.msk.f32.gmra.mxu1 %vm350_vm1, %v3491_v19 }
  0x9e   : > { %2925 = vmatprep.mubr.msk.f32.mxu1 %vm350_vm1, %v3505_v37 }
  0x9f   : > { %2897 = vmatmul.mubr.msk.f32.gmra.mxu0 %vm350_vm1, %v3456_v61 }
  0xa0   : > { %2899 = vmatprep.mubr.msk.f32.mxu0 %vm350_vm1, %v3459_v62 }
  0xa1   : > { %2926 = vmatmul.mubr.msk.f32.gmra.mxu1 %vm350_vm1, %v3515_v47 }
  0xa3   : > { %2900 = vmatmul.mubr.msk.f32.gmra.mxu0 %vm350_vm1, %v3465_v0 }
  0xa4   : > { %2930 = vmatprep.mubr.msk.f32.mxu0 %vm350_vm1, %v3578_v20 }
  0xa7   : > { %2931 = vmatmul.mubr.msk.f32.vlgmr.msra.gmra.mxu0 %vm350_vm1, %v3590_v22 }
  0xa8   : > { %2933 = vmatprep.mubr.msk.f32.mxu0 %vm350_vm1, %v3596_v29 }
  0xab   : > { %2934 = vmatmul.mubr.msk.f32.gmra.mxu0 %vm350_vm1, %v3607_v33 }
  0xac   : > { %2936 = vmatprep.mubr.msk.f32.mxu0 %vm350_vm1, %v3613_v53 }
  0xaf   : > { %2937 = vmatmul.mubr.msk.f32.gmra.mxu0 %vm350_vm1, %v3624_v41 }
  0xb0   : > { %2939 = vmatprep.mubr.msk.f32.mxu0 %vm350_vm1, %v3630_v2 }
  0xb3   : > { %2940 = vmatmul.mubr.msk.f32.gmra.mxu0 %vm350_vm1, %v3641_v49 }
  0xb4   : > { %2942 = vmatprep.mubr.msk.f32.mxu0 %vm350_vm1, %v3647_v18 }
  0xb7   : > { %2943 = vmatmul.mubr.msk.f32.gmra.mxu0 %vm350_vm1, %v3661_v54 }
  0xb8   : > { %2945 = vmatprep.mubr.msk.f32.mxu0 %vm350_vm1, %v3667_v32 }
  0xbb   : > { %2946 = vmatmul.mubr.msk.f32.gmra.mxu0 %vm350_vm1, %v3676_v40 }
  0xbc   : > { %2948 = vmatprep.mubr.msk.f32.mxu0 %vm350_vm1, %v1301_v15 }
  0xbf   : > { %2949 = vmatmul.mubr.msk.f32.gmra.mxu0 %vm350_vm1, %v1303_v45 }
  0xc0   : > { %2951 = vmatprep.mubr.msk.f32.mxu0 %vm350_vm1, %v3522_v48 }
  0xc3   : > { %2952 = vmatmul.mubr.msk.f32.gmra.mxu0 %vm350_vm1, %v3538_v7 }
  0xe4   : > { %v2750_v17 = vpop.f32.mrf.mxu1 }
  0xe6   : > { %v633_v25 = vpop.f32.mrf.mxu1 }
  0xe7   : > { %v2724_v26 = vpop.f32.mrf.mxu0 }
  0xe8   : > { %v639_v30 = vadd.f32 %v2750_v17, %v2724_v26 }
  0xe9   : > { %v453_v34 = vpop.f32.mrf.mxu0  ;;  %v2753_v35 = vpop.f32.mrf.mxu1 }
  0xea   : > { %v634_v36 = vadd.f32 %v633_v25, %v453_v34 }
  0xeb   : > { %v2727_v38 = vpop.f32.mrf.mxu0  ;;  %v643_v42 = vpop.f32.mrf.mxu1 }
  0xec   : > { %v649_v43 = vadd.f32 %v2753_v35, %v2727_v38 }
  0xed   : > { %v463_v44 = vpop.f32.mrf.mxu0  ;;  %v2756_v46 = vpop.f32.mrf.mxu1 }
  0xee   : > { %v644_v50 = vadd.f32 %v643_v42, %v463_v44 }
  0xef   : > { %v2730_v51 = vpop.f32.mrf.mxu0  ;;  %v653_v52 = vpop.f32.mrf.mxu1 }
  0xf0   : > { %v659_v55 = vadd.f32 %v2756_v46, %v2730_v51 }
  0xf1   : > { %v473_v58 = vpop.f32.mrf.mxu0  ;;  %v2759_v59 = vpop.f32.mrf.mxu1 }
  0xf2   : > { %v654_v60 = vadd.f32 %v653_v52, %v473_v58 }
  0xf3   : > { %v2733_v61 = vpop.f32.mrf.mxu0  ;;  %v663_v62 = vpop.f32.mrf.mxu1 }
  0xf4   : > { %v669_v63 = vadd.f32 %v2759_v59, %v2733_v61 }
  0xf5   : > { %v483_v0 = vpop.f32.mrf.mxu0  ;;  %v2762_v1 = vpop.f32.mrf.mxu1 }
  0xf6   : > { %v664_v9 = vadd.f32 %v663_v62, %v483_v0 }
  0xf7   : > { %v2736_v19 = vpop.f32.mrf.mxu0  ;;  %v673_v31 = vpop.f32.mrf.mxu1 }
  0xf8   : > { %v679_v37 = vadd.f32 %v2762_v1, %v2736_v19 }
  0xf9   : > { %v493_v39 = vpop.f32.mrf.mxu0  ;;  %v2765_v47 = vpop.f32.mrf.mxu1 }
  0xfa   : > { %v674_v48 = vadd.f32 %v673_v31, %v493_v39 }
  0xfb   : > { %v2739_v5 = vpop.f32.mrf.mxu0  ;;  %v683_v7 = vpop.f32.mrf.mxu1 }
  0xfc   : > { %v689_v20 = vadd.f32 %v2765_v47, %v2739_v5 }
  0xfd   : > { %v503_v22 = vpop.f32.mrf.mxu0  ;;  %v2768_v29 = vpop.f32.mrf.mxu1 }
  0xfe   : > { %v684_v33 = vadd.f32 %v683_v7, %v503_v22 }
  0xff   : > { %v2742_v53 = vpop.f32.mrf.mxu0  ;;  %v693_v6 = vpop.f32.mrf.mxu1 }
 0x100   : > { %v699_v56 = vadd.f32 %v2768_v29, %v2742_v53 }
 0x101   : > { %v513_v41 = vpop.f32.mrf.mxu0  ;;  %v2771_v57 = vpop.f32.mrf.mxu1 }
 0x102   : > { %v694_v2 = vadd.f32 %v693_v6, %v513_v41 }
 0x103   : > { %v2745_v3 = vpop.f32.mrf.mxu0  ;;  %v703_v8 = vpop.f32.mrf.mxu1 }
 0x104   : > { %v709_v49 = vadd.f32 %v2771_v57, %v2745_v3 }
 0x105   : > { %v523_v13 = vpop.f32.mrf.mxu0  ;;  %v3858_v18 = vpop.f32.mrf.mxu1 }
 0x106   : > { %v704_v4 = vadd.f32 %v703_v8, %v523_v13 }
 0x107   : > { %v2776_v21 = vpop.f32.mrf.mxu0  ;;  %v3860_v24 = vpop.f32.mrf.mxu1 }
 0x108   : > { %v3862_v54 = vadd.f32 %v2776_v21, %v639_v30 }
 0x109   : > { %v856_v27 = vpop.f32.mrf.mxu0  ;;  %v3864_v32 = vpop.f32.mrf.mxu1 }
 0x10a   : > { %v3866_v40 = vadd.f32 %v856_v27, %v634_v36 }
 0x10b   : > { %v2779_v14 = vpop.f32.mrf.mxu0  ;;  %v3868_v23 = vpop.f32.mrf.mxu1 }
 0x10c   : > { %v3870_v28 = vadd.f32 %v2779_v14, %v649_v43 }
 0x10d   : > { %v866_v10 = vpop.f32.mrf.mxu0  ;;  %v3872_v11 = vpop.f32.mrf.mxu1 }
 0x10e   : > { %v3874_v15 = vadd.f32 %v866_v10, %v644_v50 }
 0x10f   : > { %v2782_v12 = vpop.f32.mrf.mxu0  ;;  %v3876_v45 = vpop.f32.mrf.mxu1 }
 0x110   : > { %v3878_v16 = vadd.f32 %v2782_v12, %v659_v55 }
 0x111   : > { %v876_v17 = vpop.f32.mrf.mxu0  ;;  %v3880_v25 = vpop.f32.mrf.mxu1 }
 0x112   : > { %v3882_v26 = vadd.f32 %v876_v17, %v654_v60 }
 0x113   : > { %v2785_v30 = vpop.f32.mrf.mxu0  ;;  %v3884_v34 = vpop.f32.mrf.mxu1 }
 0x114   : > { %v3886_v35 = vadd.f32 %v2785_v30, %v669_v63 }
 0x115   : > { %v886_v36 = vpop.f32.mrf.mxu0  ;;  %v3888_v38 = vpop.f32.mrf.mxu1 }
 0x116   : > { %v3890_v42 = vadd.f32 %v886_v36, %v664_v9 }
 0x117   : > { %v2788_v43 = vpop.f32.mrf.mxu0  ;;  %v3892_v44 = vpop.f32.mrf.mxu1 }
 0x118   : > { %v3894_v46 = vadd.f32 %v2788_v43, %v679_v37 }
 0x119   : > { %v896_v50 = vpop.f32.mrf.mxu0  ;;  %v3896_v51 = vpop.f32.mrf.mxu1 }
 0x11a   : > { %v3898_v52 = vadd.f32 %v896_v50, %v674_v48 }
 0x11b   : > { %v2791_v55 = vpop.f32.mrf.mxu0  ;;  %v3900_v58 = vpop.f32.mrf.mxu1 }
 0x11c   : > { %v3902_v59 = vadd.f32 %v2791_v55, %v689_v20 }
 0x11d   : > { %v906_v60 = vpop.f32.mrf.mxu0  ;;  %v3904_v61 = vpop.f32.mrf.mxu1 }
 0x11e   : > { %4214 = vst [vmem:[#allocation6_spill] sm:$0xff] %v3904_v61  ;;  %v3906_v62 = vadd.f32 %v906_v60, %v684_v33  ;;  %v1107_v61 = vadd.f32 %v3860_v24, %v3866_v40  ;;  %v1112_v24 = vadd.f32 %v3872_v11, %v3878_v16 }
 0x11f   : > { %v2794_v63 = vpop.f32.mrf.mxu0  ;;  %v3908_v0 = vpop.f32.mrf.mxu1 }
 0x120   : > { %4215 = vst [vmem:[#allocation7_spill] sm:$0xff] %v3908_v0  ;;  %v3910_v1 = vadd.f32 %v2794_v63, %v699_v56  ;;  %v1108_v0 = vadd.f32 %v3858_v18, %v3862_v54 }
 0x121   : > { %v916_v9 = vpop.f32.mrf.mxu0  ;;  %v3912_v19 = vpop.f32.mrf.mxu1 }
 0x122   : > { %4216 = vst [vmem:[#allocation8_spill] sm:$0xff] %v3910_v1  ;;  %4217 = vst [vmem:[#allocation9_spill] sm:$0xff] %v3912_v19  ;;  %v3914_v31 = vadd.f32 %v916_v9, %v694_v2 }
 0x123   : > { %v2797_v37 = vpop.f32.mrf.mxu0  ;;  %v3916_v39 = vpop.f32.mrf.mxu1 }
 0x124   : > { %4218 = vst [vmem:[#allocation10_spill] sm:$0xff] %v3914_v31  ;;  %4219 = vst [vmem:[#allocation11_spill] sm:$0xff] %v3916_v39  ;;  %v3918_v47 = vadd.f32 %v2797_v37, %v709_v49 }
 0x125   : > { %v926_v48 = vpop.f32.mrf.mxu0  ;;  %v2854_v5 = vpop.f32.mrf.mxu1 }
 0x126   : > { %4220 = vst [vmem:[#allocation12_spill] sm:$0xff] %v3918_v47  ;;  %v3920_v7 = vadd.f32 %v926_v48, %v704_v4 }
 0x127   : > { %v2828_v20 = vpop.f32.mrf.mxu0  ;;  %v1379_v22 = vpop.f32.mrf.mxu1 }
 0x128   : > { %4221 = vst [vmem:[#allocation13_spill] sm:$0xff] %v3920_v7  ;;  %v1284_v1 = vadd.f32 %v2828_v20, %v1108_v0 }
 0x129   : > { %v1204_v29 = vpop.f32.mrf.mxu0  ;;  %v3922_v33 = vpop.f32.mrf.mxu1 }
 0x12a   : > { %v1459_v18 = vadd.f32 %v2854_v5, %v1284_v1 }
 0x12b   : > { %v2831_v53 = vpop.f32.mrf.mxu0  ;;  %v3924_v6 = vpop.f32.mrf.mxu1 }
 0x12d   : > { %v1214_v56 = vpop.f32.mrf.mxu0  ;;  %v3926_v41 = vpop.f32.mrf.mxu1 }
 0x12f   : > { %v2834_v57 = vpop.f32.mrf.mxu0  ;;  %v3928_v2 = vpop.f32.mrf.mxu1 }
 0x131   : > { %v3930_v3 = vpop.f32.mrf.mxu0  ;;  %v3932_v8 = vpop.f32.mrf.mxu1 }
 0x133   : > { %v3934_v49 = vpop.f32.mrf.mxu0  ;;  %v3936_v13 = vpop.f32.mrf.mxu1 }
 0x135   : > { %v3938_v4 = vpop.f32.mrf.mxu0  ;;  %v3940_v21 = vpop.f32.mrf.mxu1 }
 0x136   : > { %4222 = vst [vmem:[#allocation14_spill] sm:$0xff] %v3940_v21 }
 0x137   : > { %v3942_v27 = vpop.f32.mrf.mxu0  ;;  %v3944_v14 = vpop.f32.mrf.mxu1 }
 0x138   : > { %4223 = vst [vmem:[#allocation15_spill] sm:$0xff] %v3944_v14 }
 0x139   : > { %v3946_v10 = vpop.f32.mrf.mxu0  ;;  %v3948_v12 = vpop.f32.mrf.mxu1 }
 0x13a   : > { %4224 = vst [vmem:[#allocation16_spill] sm:$0xff] %v3948_v12 }
 0x13b   : > { %v3950_v17 = vpop.f32.mrf.mxu0  ;;  %v3952_v30 = vpop.f32.mrf.mxu1 }
 0x13c   : > { %4225 = vst [vmem:[#allocation17_spill] sm:$0xff] %v3950_v17  ;;  %4226 = vst [vmem:[#allocation18_spill] sm:$0xff] %v3952_v30 }
 0x13d   : > { %v3954_v36 = vpop.f32.mrf.mxu0  ;;  %v3956_v43 = vpop.f32.mrf.mxu1 }
 0x13e   : > { %4227 = vst [vmem:[#allocation19_spill] sm:$0xff] %v3954_v36  ;;  %4228 = vst [vmem:[#allocation20_spill] sm:$0xff] %v3956_v43 }
 0x13f   : > { %v3958_v50 = vpop.f32.mrf.mxu0  ;;  %v3960_v55 = vpop.f32.mrf.mxu1 }
 0x140   : > { %4229 = vst [vmem:[#allocation21_spill] sm:$0xff] %v3958_v50  ;;  %4230 = vst [vmem:[#allocation22_spill] sm:$0xff] %v3960_v55 }
 0x141   : > { %v3962_v60 = vpop.f32.mrf.mxu0  ;;  %v3964_v63 = vpop.f32.mrf.mxu1 }
 0x142   : > { %4231 = vst [vmem:[#allocation23_spill] sm:$0xff] %v3962_v60  ;;  %4232 = vst [vmem:[#allocation24_spill] sm:$0xff] %v3964_v63 }
 0x143   : > { %v3966_v9 = vpop.f32.mrf.mxu0  ;;  %v3968_v37 = vpop.f32.mrf.mxu1 }
 0x144   : > { %4233 = vst [vmem:[#allocation25_spill] sm:$0xff] %v3966_v9  ;;  %4234 = vst [vmem:[#allocation26_spill] sm:$0xff] %v3968_v37 }
 0x145   : > { %v3970_v48 = vpop.f32.mrf.mxu0  ;;  %v2906_v39 = vpop.f32.mrf.mxu1 }
 0x146   : > { %4235 = vst [vmem:[#allocation27_spill] sm:$0xff] %v3970_v48 }
 0x147   : > { %v2880_v30 = vpop.f32.mrf.mxu0  ;;  %v1727_v19 = vpop.f32.mrf.mxu1 }
 0x148   : > { %v1631_v20 = vadd.f32 %v2880_v30, %v1459_v18 }
 0x149   : > { %v1551_v7 = vpop.f32.mrf.mxu0  ;;  %v2909_v12 = vpop.f32.mrf.mxu1 }
 0x14b   : > { %v2883_v47 = vpop.f32.mrf.mxu0  ;;  %v1737_v36 = vpop.f32.mrf.mxu1 }
 0x14d   : > { %v1561_v43 = vpop.f32.mrf.mxu0  ;;  %v3974_v60 = vpop.f32.mrf.mxu1 }
 0x14f   : > { %v2886_v50 = vpop.f32.mrf.mxu0  ;;  %v3980_v37 = vpop.f32.mrf.mxu1 }
 0x150   : > { %4239 = vst [vmem:[#allocation31_spill] sm:$0xff] %v3980_v37 }
 0x151   : > { %v1571_v55 = vpop.f32.mrf.mxu0  ;;  %v3990_v17 = vpop.f32.mrf.mxu1 }
 0x153   : > { %v3972_v14 = vpop.f32.mrf.mxu0 }
 0x154   : > { %4236 = vst [vmem:[#allocation28_spill] sm:$0xff] %v3972_v14 }
 0x155   : > { %v3976_v63 = vpop.f32.mrf.mxu0 }
 0x156   : > { %4237 = vst [vmem:[#allocation29_spill] sm:$0xff] %v3976_v63  ;;  %v1283_v63 = vadd.f32 %v1204_v29, %v1107_v61  ;;  %v1114_v61 = vadd.f32 %v3880_v25, %v3886_v35 }
 0x157   : > { %v3978_v9 = vpop.f32.mrf.mxu0 }
 0x158   : > { %4238 = vst [vmem:[#allocation30_spill] sm:$0xff] %v3978_v9  ;;  %v1110_v9 = vadd.f32 %v3864_v32, %v3870_v28  ;;  %v1458_v40 = vadd.f32 %v1379_v22, %v1283_v63  ;;  %v1111_v32 = vadd.f32 %v3876_v45, %v3882_v26  ;;  %v1807_v22 = vadd.f32 %v2906_v39, %v1631_v20 }
 0x159   : > { %v3982_v48 = vpop.f32.mrf.mxu0  ;;  %v1113_v45 = vadd.f32 %v3884_v34, %v3890_v42  ;;  %v1290_v26 = vadd.f32 %v3934_v49, %v1114_v61  ;;  %v1116_v39 = vadd.f32 %v3888_v38, %v3894_v46  ;;  %v4250_v61 = vld [vmem:[#allocation10_spill] sm:$0xff] }
 0x15a   : > { %4240 = vst [vmem:[#allocation32_spill] sm:$0xff] %v3982_v48  ;;  %v1109_v48 = vadd.f32 %v3868_v23, %v3874_v15  ;;  %v1286_v54 = vadd.f32 %v2831_v53, %v1110_v9  ;;  %v1288_v23 = vadd.f32 %v2834_v57, %v1112_v24  ;;  %v1630_v15 = vadd.f32 %v1551_v7, %v1458_v40  ;;  %v4245_v40 = vld [vmem:[#allocation17_spill] sm:$0xff] }
 0x15b   : > { %v3986_v31 = vpop.f32.mrf.mxu0  ;;  %v1287_v16 = vadd.f32 %v3930_v3, %v1111_v32  ;;  %v1115_v3 = vadd.f32 %v3892_v44, %v3898_v52  ;;  %v1465_v49 = vadd.f32 %v3932_v8, %v1290_v26  ;;  %v1292_v30 = vadd.f32 %v3942_v27, %v1116_v39 }
 0x15c   : > { %4241 = vst [vmem:[#allocation33_spill] sm:$0xff] %v3986_v31  ;;  %v4000_v31 = vpop.f32.mrf.mxu1  ;;  %v1285_v0 = vadd.f32 %v1214_v56, %v1109_v48  ;;  %v1461_v28 = vadd.f32 %v3922_v33, %v1286_v54  ;;  %v1463_v7 = vadd.f32 %v3926_v41, %v1288_v23  ;;  %v1806_v53 = vadd.f32 %v1727_v19, %v1630_v15  ;;  %v4026_v56 = vld [vmem:[%s4206_s2] ss:$0 sm:$0xff] }
 0x15d   : > { %v3992_v21 = vpop.f32.mrf.mxu0  ;;  %v1462_v42 = vadd.f32 %v3928_v2, %v1287_v16  ;;  %v1118_v2 = vadd.f32 %v3896_v51, %v3902_v59  ;;  %v1291_v52 = vadd.f32 %v3946_v10, %v1115_v3  ;;  %v4244_v54 = vld [vmem:[#allocation14_spill] sm:$0xff]  ;;  %v4247_v10 = vld [vmem:[#allocation29_spill] sm:$0xff] }
 0x15e   : > { %4242 = vst [vmem:[#allocation34_spill] sm:$0xff] %v3992_v21  ;;  %v4013_v1 = vpop.f32.mrf.mxu1  ;;  %v1460_v11 = vadd.f32 %v3924_v6, %v1285_v0  ;;  %v1633_v29 = vadd.f32 %v2883_v47, %v1461_v28  ;;  %v1289_v47 = vadd.f32 %v3938_v4, %v1113_v45  ;;  %v1635_v41 = vadd.f32 %v2886_v50, %v1463_v7  ;;  %v4249_v23 = vld [vmem:[#allocation6_spill] sm:$0xff]  ;;  %v4253_v45 = vld [vmem:[#allocation19_spill] sm:$0xff] }
 0x15f   : > { %v3996_v37 = vpop.f32.mrf.mxu0  ;;  %v1634_v4 = vadd.f32 %v1571_v55, %v1462_v42  ;;  %v1467_v24 = vadd.f32 %v4244_v54, %v1292_v30  ;;  %v1294_v51 = vadd.f32 %v4245_v40, %v1118_v2  ;;  %v4260_v2 = vld [vmem:[#allocation13_spill] sm:$0xff] }
 0x160   : > { %v1632_v25 = vadd.f32 %v1561_v43, %v1460_v11  ;;  %v4031_v6 = vpop.f32.mrf.mxu1  ;;  %v1809_v57 = vadd.f32 %v2909_v12, %v1633_v29  ;;  %v1117_v12 = vadd.f32 %v3900_v58, %v3906_v62  ;;  %v1464_v44 = vadd.f32 %v3936_v13, %v1289_v47  ;;  %v4246_v13 = vld [vmem:[#allocation31_spill] sm:$0xff] }
 0x161   : > { %v4002_v14 = vpop.f32.mrf.mxu0  ;;  %v1811_v50 = vadd.f32 %v3974_v60, %v1635_v41  ;;  %v1810_v0 = vadd.f32 %v4246_v13, %v1634_v4  ;;  %v4248_v60 = vld [vmem:[#allocation8_spill] sm:$0xff]  ;;  %v4251_v11 = vld [vmem:[#allocation7_spill] sm:$0xff] }
 0x162   : > { %v1808_v46 = vadd.f32 %v1737_v36, %v1632_v25  ;;  %v4046_v8 = vpop.f32.mrf.mxu1  ;;  %v4243_v36 = vld [vmem:[#allocation28_spill] sm:$0xff]  ;;  %v1636_v20 = vadd.f32 %v4247_v10, %v1464_v44  ;;  %v1120_v15 = vadd.f32 %v4249_v23, %v4248_v60  ;;  %v1119_v16 = vadd.f32 %v4251_v11, %v4250_v61  ;;  %v4254_v25 = vld [vmem:[#allocation30_spill] sm:$0xff]  ;;  %v4269_v61 = vld [vmem:[#allocation27_spill] sm:$0xff] }
 0x163   : > { %v4006_v21 = vpop.f32.mrf.mxu0  ;;  %v1637_v55 = vadd.f32 %v4243_v36, %v1465_v49  ;;  %v1293_v26 = vadd.f32 %v4253_v45, %v1117_v12  ;;  %v4261_v12 = vld [vmem:[#allocation11_spill] sm:$0xff] }
 0x164   : > { %v1812_v30 = vadd.f32 %v4000_v31, %v1636_v20  ;;  %v1121_v44 = vadd.f32 %v4261_v12, %v4260_v2 }
 0x165   : > { %v4015_v5 = vpop.f32.mrf.mxu0 }
 0x166   : > { %v1297_v11 = vadd.f32 %v4269_v61, %v1121_v44 }
 0x167   : > { %v2932_v33 = vpop.f32.mrf.mxu0 }
 0x168   : > { %v1982_v35 = vadd.f32 %v2932_v33, %v1807_v22  ;;  %v4252_v22 = vld [vmem:[#allocation15_spill] sm:$0xff]  ;;  %v1777_v33 = vpop.f32.mrf.mxu1 }
 0x169   : > { %v1902_v34 = vpop.f32.mrf.mxu0  ;;  %v1466_v29 = vadd.f32 %v4252_v22, %v1291_v52  ;;  %v4262_v52 = vld [vmem:[#allocation18_spill] sm:$0xff] }
 0x16a   : > { %v1981_v19 = vadd.f32 %v1902_v34, %v1806_v53  ;;  %v2005_v43 = vadd.f32 %v4026_v56, %v1982_v35  ;;  %v1813_v53 = vadd.f32 %v3990_v17, %v1637_v55  ;;  %v1639_v35 = vadd.f32 %v4254_v25, %v1467_v24  ;;  %v4255_v34 = vld [vmem:[#allocation16_spill] sm:$0xff]  ;;  %v2924_v55 = vpop.f32.mrf.mxu1 }
 0x16b   : > { %v2935_v38 = vpop.f32.mrf.mxu0  ;;  %v1469_v42 = vadd.f32 %v4255_v34, %v1294_v51  ;;  %v4258_v17 = vld [vmem:[#allocation12_spill] sm:$0xff] }
 0x16c   : > { %v2004_v63 = vadd.f32 %v4026_v56, %v1981_v19  ;;  %v1984_v9 = vadd.f32 %v2935_v38, %v1809_v57  ;;  %v2021_v59 = vmax.f32 %v2005_v43, 0.0  ;;  %v4256_v57 = vld [vmem:[#allocation21_spill] sm:$0xff]  ;;  %v4257_v43 = vld [vmem:[#allocation32_spill] sm:$0xff]  ;;  %v1815_v31 = vadd.f32 %v4013_v1, %v1639_v35  ;;  %v4268_v1 = vld [vmem:[#allocation22_spill] sm:$0xff] }
 0x16d   : > { %v1912_v27 = vpop.f32.mrf.mxu0  ;;  %v1296_v41 = vadd.f32 %v4256_v57, %v1120_v15  ;;  %v1638_v38 = vadd.f32 %v4257_v43, %v1466_v29  ;;  %v4265_v51 = vld [vmem:[#allocation20_spill] sm:$0xff] }
 0x16e   : > { %v2020_v48 = vmax.f32 %v2004_v63, 0.0  ;;  %v1983_v18 = vadd.f32 %v1912_v27, %v1808_v46  ;;  %v2007_v58 = vadd.f32 %v4026_v56, %v1984_v9  ;;  %v4259_v63 = vld [vmem:[#allocation9_spill] sm:$0xff]  ;;  %v1468_v27 = vadd.f32 %v4262_v52, %v1293_v26 }
 0x16f   : > { %v2938_v62 = vpop.f32.mrf.mxu0  ;;  %v1122_v9 = vadd.f32 %v4259_v63, %v4258_v17  ;;  %v1814_v20 = vadd.f32 %v4031_v6, %v1638_v38 }
 0x170   : > { %v2006_v32 = vadd.f32 %v4026_v56, %v1983_v18  ;;  %v1986_v28 = vadd.f32 %v2938_v62, %v1811_v50  ;;  %2956 = vmatprep.mubr.msk.f32.mxu1 %vm350_vm1, %v2020_v48  ;;  %v2023_v19 = vmax.f32 %v2007_v58, 0.0  ;;  %v4263_v50 = vld [vmem:[#allocation23_spill] sm:$0xff]  ;;  %v4264_v18 = vld [vmem:[#allocation33_spill] sm:$0xff] }
 0x171   : > { %v1922_v7 = vpop.f32.mrf.mxu0  ;;  %2957 = vmatmul.mubr.msk.f32.vlgmr.msra.gmra.mxu1 %vm350_vm1, %v2021_v59  ;;  %v1295_v36 = vadd.f32 %v4263_v50, %v1119_v16  ;;  %v1641_v54 = vadd.f32 %v4264_v18, %v1469_v42  ;;  %v1471_v59 = vadd.f32 %v4265_v51, %v1296_v41  ;;  %v4266_v58 = vld [vmem:[#allocation25_spill] sm:$0xff]  ;;  %v1787_v16 = vpop.f32.mrf.mxu1  ;;  %v4271_v41 = vld [vmem:[#allocation26_spill] sm:$0xff] }
 0x172   : > { %v2022_v39 = vmax.f32 %v2006_v32, 0.0  ;;  %v1985_v47 = vadd.f32 %v1922_v7, %v1810_v0  ;;  %v2009_v3 = vadd.f32 %v4026_v56, %v1986_v28  ;;  %v1298_v62 = vadd.f32 %v4266_v58, %v1122_v9  ;;  %v4267_v32 = vld [vmem:[#allocation34_spill] sm:$0xff]  ;;  %v4270_v7 = vld [vmem:[#allocation24_spill] sm:$0xff] }
 0x173   : > { %v2941_v49 = vpop.f32.mrf.mxu0  ;;  %v1640_v28 = vadd.f32 %v4267_v32, %v1468_v27  ;;  %v1470_v15 = vadd.f32 %v4268_v1, %v1295_v36  ;;  %v1817_v29 = vadd.f32 %v4046_v8, %v1641_v54  ;;  %v1643_v45 = vadd.f32 %v3996_v37, %v1471_v59  ;;  %v2526_v58 = vld [vmem:[%s4208_s4] ss:$0 sm:$0xff] }
 0x174   : > { %v2008_v46 = vadd.f32 %v4026_v56, %v1985_v47  ;;  %v1988_v4 = vadd.f32 %v2941_v49, %v1813_v53  ;;  %2959 = vmatprep.mubr.msk.f32.mxu1 %vm350_vm1, %v2022_v39  ;;  %v2025_v13 = vmax.f32 %v2009_v3, 0.0  ;;  %v1473_v53 = vadd.f32 %v4270_v7, %v1298_v62 }
 0x175   : > { %v1932_v48 = vpop.f32.mrf.mxu0  ;;  %2960 = vmatmul.mubr.msk.f32.gmra.mxu1 %vm350_vm1, %v2023_v19  ;;  %v1816_v47 = vadd.f32 %v1777_v33, %v1640_v28  ;;  %v1642_v34 = vadd.f32 %v4002_v14, %v1470_v15  ;;  %v1472_v8 = vadd.f32 %v4271_v41, %v1297_v11  ;;  %v2927_v19 = vpop.f32.mrf.mxu1  ;;  %v1819_v3 = vadd.f32 %v2924_v55, %v1643_v45 }
 0x176   : > { %v2024_v24 = vmax.f32 %v2008_v46, 0.0  ;;  %v1987_v40 = vadd.f32 %v1932_v48, %v1812_v30  ;;  %v2011_v0 = vadd.f32 %v4026_v56, %v1988_v4  ;;  %v1645_v49 = vadd.f32 %v4006_v21, %v1473_v53 }
 0x177   : > { %v2944_v10 = vpop.f32.mrf.mxu0  ;;  %v1818_v46 = vadd.f32 %v1787_v16, %v1642_v34  ;;  %v1644_v4 = vadd.f32 %v4015_v5, %v1472_v8  ;;  %v1797_v9 = vpop.f32.mrf.mxu1 }
 0x178   : > { %v2010_v60 = vadd.f32 %v4026_v56, %v1987_v40  ;;  %v1990_v23 = vadd.f32 %v2944_v10, %v1815_v31  ;;  %2962 = vmatprep.mubr.msk.f32.mxu1 %vm350_vm1, %v2024_v24  ;;  %v2027_v25 = vmax.f32 %v2011_v0, 0.0  ;;  %v1821_v12 = vadd.f32 %v2927_v19, %v1645_v49 }
 0x179   : > { %v1942_v22 = vpop.f32.mrf.mxu0  ;;  %2963 = vmatmul.mubr.msk.f32.gmra.mxu1 %vm350_vm1, %v2025_v13  ;;  %v1820_v36 = vadd.f32 %v1797_v9, %v1644_v4 }
 0x17a   : > { %v2026_v6 = vmax.f32 %v2010_v60, 0.0  ;;  %v1989_v26 = vadd.f32 %v1942_v22, %v1814_v20  ;;  %v2013_v35 = vadd.f32 %v4026_v56, %v1990_v23 }
 0x17b   : > { %v2947_v39 = vpop.f32.mrf.mxu0 }
 0x17c   : > { %v2012_v42 = vadd.f32 %v4026_v56, %v1989_v26  ;;  %v1992_v57 = vadd.f32 %v2947_v39, %v1817_v29  ;;  %2965 = vmatprep.mubr.msk.f32.mxu1 %vm350_vm1, %v2026_v6  ;;  %v2029_v38 = vmax.f32 %v2013_v35, 0.0 }
 0x17d   : > { %v1952_v37 = vpop.f32.mrf.mxu0  ;;  %2966 = vmatmul.mubr.msk.f32.gmra.mxu1 %vm350_vm1, %v2027_v25 }
 0x17e   : > { %v2028_v30 = vmax.f32 %v2012_v42, 0.0  ;;  %v1991_v43 = vadd.f32 %v1952_v37, %v1816_v47  ;;  %v2015_v33 = vadd.f32 %v4026_v56, %v1992_v57 }
 0x17f   : > { %v2950_v14 = vpop.f32.mrf.mxu0 }
 0x180   : > { %v2014_v17 = vadd.f32 %v4026_v56, %v1991_v43  ;;  %v1994_v63 = vadd.f32 %v2950_v14, %v1819_v3  ;;  %2968 = vmatprep.mubr.msk.f32.mxu1 %vm350_vm1, %v2028_v30  ;;  %v2031_v52 = vmax.f32 %v2015_v33, 0.0 }
 0x181   : > { %v1962_v2 = vpop.f32.mrf.mxu0  ;;  %2969 = vmatmul.mubr.msk.f32.gmra.mxu1 %vm350_vm1, %v2029_v38 }
 0x182   : > { %v2030_v21 = vmax.f32 %v2014_v17, 0.0  ;;  %v1993_v44 = vadd.f32 %v1962_v2, %v1818_v46  ;;  %v2017_v27 = vadd.f32 %v4026_v56, %v1994_v63 }
 0x183   : > { %v2953_v50 = vpop.f32.mrf.mxu0 }
 0x184   : > { %v2016_v55 = vadd.f32 %v4026_v56, %v1993_v44  ;;  %v1996_v5 = vadd.f32 %v2953_v50, %v1821_v12  ;;  %2971 = vmatprep.mubr.msk.f32.mxu1 %vm350_vm1, %v2030_v21  ;;  %v2033_v54 = vmax.f32 %v2017_v27, 0.0 }
 0x185   : > { %v1972_v48 = vpop.f32.mrf.mxu0  ;;  %2972 = vmatmul.mubr.msk.f32.gmra.mxu1 %vm350_vm1, %v2031_v52 }
 0x186   : > { %v2032_v31 = vmax.f32 %v2016_v55, 0.0  ;;  %v1995_v18 = vadd.f32 %v1972_v48, %v1820_v36  ;;  %v2019_v24 = vadd.f32 %v4026_v56, %v1996_v5 }
 0x188   : > { %v2018_v40 = vadd.f32 %v4026_v56, %v1995_v18  ;;  %2974 = vmatprep.mubr.msk.f32.mxu1 %vm350_vm1, %v2032_v31  ;;  %v2035_v59 = vmax.f32 %v2019_v24, 0.0 }
 0x189   : > { %2975 = vmatmul.mubr.msk.f32.gmra.mxu1 %vm350_vm1, %v2033_v54 }
 0x18a   : > { %v2034_v51 = vmax.f32 %v2018_v40, 0.0 }
 0x18c   : > { %2977 = vmatprep.mubr.msk.f32.mxu1 %vm350_vm1, %v2034_v51 }
 0x18d   : > { %2978 = vmatmul.mubr.msk.f32.gmra.mxu1 %vm350_vm1, %v2035_v59 }
 0x231   : > { %v2958_v62 = vpop.f32.mrf.mxu1 }
 0x232   : > { %v2167_v13 = vadd.f32 %v2958_v62, %v2526_v58 }
 0x233   : > { %v2161_v56 = vpop.f32.mrf.mxu1 }
 0x234   : > { %2241 = vst [vmem:[%s4123_s30 + $0x8] sm:$0xff] %v2167_v13  ;;  %v2162_v0 = vadd.f32 %v2526_v58, %v2161_v56 }
 0x235   : > { %v2961_v10 = vpop.f32.mrf.mxu1 }
 0x236   : > { %2240 = vst [vmem:[%s4123_s30] sm:$0xff] %v2162_v0  ;;  %v2177_v20 = vadd.f32 %v2961_v10, %v2526_v58 }
 0x237   : > { %v2171_v32 = vpop.f32.mrf.mxu1 }
 0x238   : > { %2243 = vst [vmem:[%s4123_s30 + $0x18] sm:$0xff] %v2177_v20  ;;  %v2172_v28 = vadd.f32 %v2526_v58, %v2171_v32 }
 0x239   : > { %v2964_v60 = vpop.f32.mrf.mxu1 }
 0x23a   : > { %2242 = vst [vmem:[%s4123_s30 + $0x10] sm:$0xff] %v2172_v28  ;;  %v2187_v23 = vadd.f32 %v2964_v60, %v2526_v58 }
 0x23b   : > { %v2181_v1 = vpop.f32.mrf.mxu1 }
 0x23c   : > { %2245 = vst [vmem:[%s4123_s30 + $0x28] sm:$0xff] %v2187_v23  ;;  %v2182_v15 = vadd.f32 %v2526_v58, %v2181_v1 }
 0x23d   : > { %v2967_v61 = vpop.f32.mrf.mxu1 }
 0x23e   : > { %2244 = vst [vmem:[%s4123_s30 + $0x20] sm:$0xff] %v2182_v15  ;;  %v2197_v11 = vadd.f32 %v2967_v61, %v2526_v58 }
 0x23f   : > { %v2191_v16 = vpop.f32.mrf.mxu1 }
 0x240   : > { %2247 = vst [vmem:[%s4123_s30 + $0x38] sm:$0xff] %v2197_v11  ;;  %v2192_v22 = vadd.f32 %v2526_v58, %v2191_v16 }
 0x241   : > { %v2970_v29 = vpop.f32.mrf.mxu1 }
 0x242   : > { %2246 = vst [vmem:[%s4123_s30 + $0x30] sm:$0xff] %v2192_v22  ;;  %v2207_v45 = vadd.f32 %v2970_v29, %v2526_v58 }
 0x243   : > { %v2201_v6 = vpop.f32.mrf.mxu1 }
 0x244   : > { %2249 = vst [vmem:[%s4123_s30 + $0x48] sm:$0xff] %v2207_v45  ;;  %v2202_v26 = vadd.f32 %v2526_v58, %v2201_v6 }
 0x245   : > { %v2973_v7 = vpop.f32.mrf.mxu1 }
 0x246   : > { %2248 = vst [vmem:[%s4123_s30 + $0x40] sm:$0xff] %v2202_v26  ;;  %v2217_v53 = vadd.f32 %v2973_v7, %v2526_v58 }
 0x247   : > { %v2211_v25 = vpop.f32.mrf.mxu1 }
 0x248   : > { %2251 = vst [vmem:[%s4123_s30 + $0x58] sm:$0xff] %v2217_v53  ;;  %v2212_v35 = vadd.f32 %v2526_v58, %v2211_v25 }
 0x249   : > { %v2976_v39 = vpop.f32.mrf.mxu1 }
 0x24a   : > { %2250 = vst [vmem:[%s4123_s30 + $0x50] sm:$0xff] %v2212_v35  ;;  %v2227_v47 = vadd.f32 %v2976_v39, %v2526_v58 }
 0x24b   : > { %v2221_v34 = vpop.f32.mrf.mxu1 }
 0x24c   : > { %2253 = vst [vmem:[%s4123_s30 + $0x68] sm:$0xff] %v2227_v47  ;;  %v2222_v42 = vadd.f32 %v2526_v58, %v2221_v34 }
 0x24d   : > { %v2979_v57 = vpop.f32.mrf.mxu1 }
 0x24e   : > { %2252 = vst [vmem:[%s4123_s30 + $0x60] sm:$0xff] %v2222_v42  ;;  %v2237_v41 = vadd.f32 %v2979_v57, %v2526_v58 }
 0x24f   : > { %v2231_v8 = vpop.f32.mrf.mxu1 }
 0x250   : > { %2255 = vst [vmem:[%s4123_s30 + $0x78] sm:$0xff] %v2237_v41  ;;  %v2232_v19 = vadd.f32 %v2526_v58, %v2231_v8 }
 0x252   : > { %2254 = vst [vmem:[%s4123_s30 + $0x70] sm:$0xff] %v2232_v19 }
 0x253   : > { %3068 = shalt.err (!%p3065_p7)
}
 0x254   : > { %s3069_s17 = scalar_lea.hbm %s4145_s14, 2048  ;;  %s3073_s9 = scalar_lea.hbm %s4209_s5, 8192 }
 0x255   : > { %p3070_p9 = scmp.ne.s32.totalorder %s4145_s14, %s3069_s17  ;;  %p3074_p12 = scmp.lt.s32.totalorder %s4145_s14, %s4209_s5 }
 0x256   : > { %p3075_p13 = scmp.lt.s32.totalorder %s3073_s9, %s3069_s17 }
 0x257   : > { %p3071_p10 = pnand %p3070_p9, %p3233_p3 }
 0x258   : > { %p3076_p0 = por %p3075_p13, %p3074_p12 }
 0x259   : > { %p3072_p11 = pneg %p3071_p10 }
 0x25b   : > { %p3077_p1 = pnand %p3076_p0, %p3072_p11 }
 0x25d   : > { %3080 = shalt.err (!%p3077_p1)
}
 0x25e   : > { %s3150_s21 = smov 128   ;;  %s3151_s22 = smov 8  }
 0x25f   : > { %2982 = dma.vmem_to_hbm [thread:$0]  (%p3233_p3), %s4147_s13, 2048, %s4145_s14, %s4153_s15, %s3150_s21, %s3150_s21, %s3151_s22  }
 0x260 PF: > { %p2988_p2 = scmp.ge.s32.totalorder %s3147_s25, 2  ;;  %s2287_s16 = sand.u32 1, %s3119_s18  }
 0x261   : > { %s2288_s29 = scalar_lea.sflag [#allocation3], %s2287_s16 }
 0x262   : > { %p2985_p4 = pnand %p2988_p2, %p3242_p8 }
 0x264   : > { %p2986_p5 = pneg %p2985_p4 }
 0x266   : > { %3114 = dma.done.wait (%p2986_p5), %s2288_s29, 2048  }
 0x267   : > { %3116 = vsyncadd (%p2986_p5), %s2288_s29, 4294965248  ;;  %s18_s25 = sadd.s32 1, %s3147_s25   ;;  %s4272_s6 = sld [smem:[#allocation5_spill]] }
 0x268   : > { %p15_p6 = scmp.ge.s32.totalorder %s18_s25, 6   ;;  %s4273_s18 = smov %s3123_s19 }
 0x269   : > { %s4274_s19 = smov %s3127_s20  ;;  %s4275_s20 = smov %s3251_s11 }
 0x26a   : > { %s4276_s21 = smov %s3139_s23  ;;  %s4277_s22 = smov %s3143_s24 }
 0x26b   : > { %s4278_s23 = smov %s4281_s28  ;;  %17 = sbr.rel (!%p15_p6) target bundleno = 5 (0x5), region = 83 }
 0x26d   : > { %s4279_s24 = smov %s4272_s6 }
 0x270   :  { %2293 = vsyncpa [#allocation3], 1 }
 0x271   :  { %2295 = vsyncpa [#allocation3 + $0x1], 1 }

</bundles_post_ra>
